<compile_context>
chip_gen: v7x
topology: tpu7x:2x2x1
jax: 0.10.0
libtpu: 0.0.40
codegen_flags: <defaults>
</compile_context>

<pallas_src>
import math

import jax
import jax.numpy as jnp
import numpy as np
from jax import lax
from jax.experimental import pallas as pl
from jax.experimental.pallas import tpu as pltpu

# ---------------- model hyper-parameters (small, synthetic) ----------------
B = 2         # batch
T = 8         # time_len
D = 32        # dim
H = 4         # num query heads
G = 2         # num kv heads (groups)
HD = D // H   # head dim = 8
FF = 64       # ffn hidden dim
EPS = 1e-5    # LayerNorm eps
BT = B * T    # rows after folding batch into the row dimension

_HIGHEST = jax.lax.Precision.HIGHEST


def _dot(a, b):
    return jnp.dot(a, b, preferred_element_type=jnp.float32, precision=_HIGHEST)


def _layernorm(h, w, b):
    mu = jnp.mean(h, axis=-1, keepdims=True)
    var = jnp.mean((h - mu) ** 2, axis=-1, keepdims=True)
    return (h - mu) * lax.rsqrt(var + EPS) * w + b


def encoder_layer_kernel(x_ref, ln1w_ref, ln1b_ref, wqkv_ref, wo_ref,
                         ln2w_ref, ln2b_ref, w1_ref, b1_ref, w2_ref, b2_ref,
                         o_ref, ctx_ref):
    hpg = H // G
    x = x_ref[...]                                         # (BT, D)

    # ---- pre-norm + fused QKV projection over all B*T rows ----
    h1 = _layernorm(x, ln1w_ref[...], ln1b_ref[...])       # (BT, D)
    qkv = _dot(h1, wqkv_ref[...])                          # (BT, 64); scale folded into Q cols

    q_all = qkv[:, :H * HD]                                # (BT, 32)
    k_all = qkv[:, H * HD:H * HD + G * HD]                 # (BT, 16)
    v_all = qkv[:, H * HD + G * HD:]                       # (BT, 16)

    # ---- per-(batch, head) attention core; heads packed into ctx scratch ----
    for b in range(B):                                     # static, B = 2
        r0 = b * T
        for hi in range(H):                                # static, H = 4
            g = hi // hpg                                  # repeat_interleave group sharing
            qh = q_all[r0:r0 + T, hi * HD:(hi + 1) * HD]   # (T, HD)
            kg = k_all[r0:r0 + T, g * HD:(g + 1) * HD]     # (T, HD)
            vg = v_all[r0:r0 + T, g * HD:(g + 1) * HD]     # (T, HD)
            # q @ k^T without an explicit transpose (contract last dims);
            # softmax scale already folded into the Q projection weights.
            s = lax.dot_general(qh, kg, (((1,), (1,)), ((), ())),
                                precision=_HIGHEST,
                                preferred_element_type=jnp.float32)  # (T, T)
            m = jnp.max(s, axis=-1, keepdims=True)
            p = jnp.exp(s - m)
            p = p / jnp.sum(p, axis=-1, keepdims=True)     # exact normalization
            ctx_ref[r0:r0 + T, hi * HD:(hi + 1) * HD] = _dot(p, vg)  # (T, HD)

    # ---- single fused output projection over all rows and heads ----
    attn = _dot(ctx_ref[...], wo_ref[...])                 # (BT, D)
    xr = x + attn                                          # residual (dropout_p = 0.0)

    # ---- pre-norm feed-forward block over all B*T rows ----
    h2 = _layernorm(xr, ln2w_ref[...], ln2b_ref[...])
    f = _dot(h2, w1_ref[...]) + b1_ref[...]
    f = jax.nn.gelu(f)
    f = _dot(f, w2_ref[...]) + b2_ref[...]

    o_ref[...] = xr + f                                    # one lane-dense slab store


def transformer_encoder_layer(x, params):
    (ln1w, ln1b, wq, wk, wv, wo, ln2w, ln2b, w1, b1, w2, b2) = params
    scale = 1.0 / math.sqrt(HD)

    # Host-side layout plumbing (free): fuse Q/K/V weights into one lane-dense
    # (D, 64) matrix and fold the softmax scale into the Q columns.
    wqkv = jnp.concatenate([wq * scale, wk, wv], axis=-1)  # (D, H*HD + 2*G*HD)
    x2 = x.reshape(BT, D)                                  # fold batch into rows

    inputs = (x2, ln1w, ln1b, wqkv, wo, ln2w, ln2b, w1, b1, w2, b2)
    vmem = pl.BlockSpec(memory_space=pltpu.MemorySpace.VMEM)

    out = pl.pallas_call(
        encoder_layer_kernel,
        out_shape=jax.ShapeDtypeStruct((BT, D), jnp.float32),
        in_specs=[vmem] * len(inputs),
        out_specs=vmem,
        scratch_shapes=[pltpu.VMEM((BT, H * HD), jnp.float32)],  # packed head contexts
    )(*inputs)
    return out.reshape(B, T, D)


# ------------------------- pure-JAX reference -------------------------
def reference(x, params):
    (ln1w, ln1b, wq, wk, wv, wo, ln2w, ln2b, w1, b1, w2, b2) = params
    scale = 1.0 / math.sqrt(HD)
    hpg = H // G
    out = []
    for b in range(x.shape[0]):
        xb = x[b]
        h = _layernorm(xb, ln1w, ln1b)
        q = _dot(h, wq)
        k = _dot(h, wk)
        v = _dot(h, wv)
        heads = []
        for hi in range(H):
            g = hi // hpg
            qh = q[:, hi * HD:(hi + 1) * HD]
            kh = k[:, g * HD:(g + 1) * HD]
            vh = v[:, g * HD:(g + 1) * HD]
            s = _dot(qh, kh.T) * scale
            p = jax.nn.softmax(s, axis=-1)
            heads.append(_dot(p, vh))
        attn = _dot(jnp.concatenate(heads, axis=-1), wo)
        xb = xb + attn
        h2 = _layernorm(xb, ln2w, ln2b)
        f = _dot(jax.nn.gelu(_dot(h2, w1) + b1), w2) + b2
        out.append(xb + f)
    return jnp.stack(out)


def make_params(key):
    ks = jax.random.split(key, 6)
    scale = 0.02
    ln1w = jnp.ones((1, D), jnp.float32)
    ln1b = jnp.zeros((1, D), jnp.float32)
    wq = scale * jax.random.normal(ks[0], (D, H * HD), jnp.float32)
    wk = scale * jax.random.normal(ks[1], (D, G * HD), jnp.float32)
    wv = scale * jax.random.normal(ks[2], (D, G * HD), jnp.float32)
    wo = scale * jax.random.normal(ks[3], (H * HD, D), jnp.float32)
    ln2w = jnp.ones((1, D), jnp.float32)
    ln2b = jnp.zeros((1, D), jnp.float32)
    w1 = scale * jax.random.normal(ks[4], (D, FF), jnp.float32)
    b1 = jnp.zeros((1, FF), jnp.float32)
    w2 = scale * jax.random.normal(ks[5], (FF, D), jnp.float32)
    b2 = jnp.zeros((1, D), jnp.float32)
    return (ln1w, ln1b, wq, wk, wv, wo, ln2w, ln2b, w1, b1, w2, b2)


if __name__ == "__main__":
    key = jax.random.PRNGKey(0)
    kx, kp = jax.random.split(key)
    x = jax.random.normal(kx, (B, T, D), jnp.float32)
    params = make_params(kp)

    out = transformer_encoder_layer(x, params)
    out = jax.block_until_ready(out)

    ref = reference(x, params)
    # Exact softmax normalization + HIGHEST-precision dots -> tight tolerance
    # (only residual difference is the host-side folding of the softmax scale
    # into the Q projection weights).
    np.testing.assert_allclose(np.asarray(out), np.asarray(ref),
                               rtol=2e-4, atol=1e-5)
    print("KERNEL_OK")
</pallas_src>

<mosaic_0001>
module attributes {stable_mosaic.version = 11 : i64} {
  func.func @encoder_layer_kernel(%arg0: memref<16x32xf32, #tpu.memory_space<vmem>>, %arg1: memref<1x32xf32, #tpu.memory_space<vmem>>, %arg2: memref<1x32xf32, #tpu.memory_space<vmem>>, %arg3: memref<32x64xf32, #tpu.memory_space<vmem>>, %arg4: memref<32x32xf32, #tpu.memory_space<vmem>>, %arg5: memref<1x32xf32, #tpu.memory_space<vmem>>, %arg6: memref<1x32xf32, #tpu.memory_space<vmem>>, %arg7: memref<32x64xf32, #tpu.memory_space<vmem>>, %arg8: memref<1x64xf32, #tpu.memory_space<vmem>>, %arg9: memref<64x32xf32, #tpu.memory_space<vmem>>, %arg10: memref<1x32xf32, #tpu.memory_space<vmem>>, %arg11: memref<16x32xf32, #tpu.memory_space<vmem>>, %arg12: memref<16x32xf32, #tpu.memory_space<vmem>>) attributes {dimension_semantics = [], scalar_prefetch = 0 : i64, scratch_operands = 1 : i64, tpu.core_type = #tpu.core_type<tc>} {
    %c0 = arith.constant 0 : index
    %c0_0 = arith.constant 0 : index
    %0 = vector.load %arg0[%c0, %c0_0] : memref<16x32xf32, #tpu.memory_space<vmem>>, vector<16x32xf32>
    %c0_1 = arith.constant 0 : index
    %c0_2 = arith.constant 0 : index
    %1 = vector.load %arg1[%c0_1, %c0_2] : memref<1x32xf32, #tpu.memory_space<vmem>>, vector<1x32xf32>
    %c0_3 = arith.constant 0 : index
    %c0_4 = arith.constant 0 : index
    %2 = vector.load %arg2[%c0_3, %c0_4] : memref<1x32xf32, #tpu.memory_space<vmem>>, vector<1x32xf32>
    %cst = arith.constant dense<0.000000e+00> : vector<16xf32>
    %3 = vector.multi_reduction <add>, %0, %cst [1] : vector<16x32xf32> to vector<16xf32>
    %4 = vector.shape_cast %3 : vector<16xf32> to vector<16x1xf32>
    %cst_5 = arith.constant 3.200000e+01 : f32
    %5 = vector.broadcast %cst_5 : f32 to vector<16x1xf32>
    %6 = arith.divf %4, %5 : vector<16x1xf32>
    %7 = vector.broadcast %6 : vector<16x1xf32> to vector<16x32xf32>
    %8 = arith.subf %0, %7 : vector<16x32xf32>
    %9 = arith.mulf %8, %8 : vector<16x32xf32>
    %cst_6 = arith.constant dense<0.000000e+00> : vector<16xf32>
    %10 = vector.multi_reduction <add>, %9, %cst_6 [1] : vector<16x32xf32> to vector<16xf32>
    %11 = vector.shape_cast %10 : vector<16xf32> to vector<16x1xf32>
    %cst_7 = arith.constant 3.200000e+01 : f32
    %12 = vector.broadcast %cst_7 : f32 to vector<16x1xf32>
    %13 = arith.divf %11, %12 : vector<16x1xf32>
    %14 = vector.broadcast %6 : vector<16x1xf32> to vector<16x32xf32>
    %15 = arith.subf %0, %14 : vector<16x32xf32>
    %cst_8 = arith.constant 9.99999974E-6 : f32
    %16 = vector.broadcast %cst_8 : f32 to vector<16x1xf32>
    %17 = arith.addf %13, %16 : vector<16x1xf32>
    %18 = math.rsqrt %17 : vector<16x1xf32>
    %19 = vector.broadcast %18 : vector<16x1xf32> to vector<16x32xf32>
    %20 = arith.mulf %15, %19 : vector<16x32xf32>
    %21 = vector.broadcast %1 : vector<1x32xf32> to vector<16x32xf32>
    %22 = arith.mulf %20, %21 : vector<16x32xf32>
    %23 = vector.broadcast %2 : vector<1x32xf32> to vector<16x32xf32>
    %24 = arith.addf %22, %23 : vector<16x32xf32>
    %c0_9 = arith.constant 0 : index
    %c0_10 = arith.constant 0 : index
    %25 = vector.load %arg3[%c0_9, %c0_10] : memref<32x64xf32, #tpu.memory_space<vmem>>, vector<32x64xf32>
    %cst_11 = arith.constant dense<0.000000e+00> : vector<16x64xf32>
    %26 = tpu.matmul %24, %25, %cst_11 {dimension_numbers = #tpu.dot_dimension_numbers<[1], [0], [0], [1], [0, 0, 1, 1], [], []>, precision = #tpu.contract_precision<fp32>} : vector<16x32xf32>, vector<32x64xf32>, vector<16x64xf32> -> vector<16x64xf32>
    %27 = vector.extract_strided_slice %26 {offsets = [0, 0], sizes = [16, 32], strides = [1, 1]} : vector<16x64xf32> to vector<16x32xf32>
    %28 = vector.extract_strided_slice %26 {offsets = [0, 32], sizes = [16, 16], strides = [1, 1]} : vector<16x64xf32> to vector<16x16xf32>
    %29 = vector.extract_strided_slice %26 {offsets = [0, 48], sizes = [16, 16], strides = [1, 1]} : vector<16x64xf32> to vector<16x16xf32>
    %30 = vector.extract_strided_slice %27 {offsets = [0, 0], sizes = [8, 8], strides = [1, 1]} : vector<16x32xf32> to vector<8x8xf32>
    %31 = vector.extract_strided_slice %28 {offsets = [0, 0], sizes = [8, 8], strides = [1, 1]} : vector<16x16xf32> to vector<8x8xf32>
    %32 = vector.extract_strided_slice %29 {offsets = [0, 0], sizes = [8, 8], strides = [1, 1]} : vector<16x16xf32> to vector<8x8xf32>
    %cst_12 = arith.constant dense<0.000000e+00> : vector<8x8xf32>
    %33 = tpu.matmul %30, %31, %cst_12 {dimension_numbers = #tpu.dot_dimension_numbers<[1], [1], [0], [0], [0, 0, 1, 0], [], []>, precision = #tpu.contract_precision<fp32>} : vector<8x8xf32>, vector<8x8xf32>, vector<8x8xf32> -> vector<8x8xf32>
    %cst_13 = arith.constant dense<0xFF800000> : vector<8xf32>
    %34 = vector.multi_reduction <maximumf>, %33, %cst_13 [1] : vector<8x8xf32> to vector<8xf32>
    %35 = vector.shape_cast %34 : vector<8xf32> to vector<8x1xf32>
    %36 = vector.broadcast %35 : vector<8x1xf32> to vector<8x8xf32>
    %37 = arith.subf %33, %36 : vector<8x8xf32>
    %38 = math.exp %37 : vector<8x8xf32>
    %cst_14 = arith.constant dense<0.000000e+00> : vector<8xf32>
    %39 = vector.multi_reduction <add>, %38, %cst_14 [1] : vector<8x8xf32> to vector<8xf32>
    %40 = vector.shape_cast %39 : vector<8xf32> to vector<8x1xf32>
    %41 = vector.broadcast %40 : vector<8x1xf32> to vector<8x8xf32>
    %42 = arith.divf %38, %41 : vector<8x8xf32>
    %cst_15 = arith.constant dense<0.000000e+00> : vector<8x8xf32>
    %43 = tpu.matmul %42, %32, %cst_15 {dimension_numbers = #tpu.dot_dimension_numbers<[1], [0], [0], [1], [0, 0, 1, 1], [], []>, precision = #tpu.contract_precision<fp32>} : vector<8x8xf32>, vector<8x8xf32>, vector<8x8xf32> -> vector<8x8xf32>
    %c0_16 = arith.constant 0 : index
    %c0_17 = arith.constant 0 : index
    %44 = vector.load %arg12[%c0_16, %c0_17] : memref<16x32xf32, #tpu.memory_space<vmem>>, vector<8x8xf32>
    tpu.vector_store %arg12[%c0_16, %c0_17], %43 {strides = array<i32>} : memref<16x32xf32, #tpu.memory_space<vmem>>, vector<8x8xf32>,
    %45 = vector.extract_strided_slice %27 {offsets = [0, 8], sizes = [8, 8], strides = [1, 1]} : vector<16x32xf32> to vector<8x8xf32>
    %46 = vector.extract_strided_slice %28 {offsets = [0, 0], sizes = [8, 8], strides = [1, 1]} : vector<16x16xf32> to vector<8x8xf32>
    %47 = vector.extract_strided_slice %29 {offsets = [0, 0], sizes = [8, 8], strides = [1, 1]} : vector<16x16xf32> to vector<8x8xf32>
    %cst_18 = arith.constant dense<0.000000e+00> : vector<8x8xf32>
    %48 = tpu.matmul %45, %46, %cst_18 {dimension_numbers = #tpu.dot_dimension_numbers<[1], [1], [0], [0], [0, 0, 1, 0], [], []>, precision = #tpu.contract_precision<fp32>} : vector<8x8xf32>, vector<8x8xf32>, vector<8x8xf32> -> vector<8x8xf32>
    %cst_19 = arith.constant dense<0xFF800000> : vector<8xf32>
    %49 = vector.multi_reduction <maximumf>, %48, %cst_19 [1] : vector<8x8xf32> to vector<8xf32>
    %50 = vector.shape_cast %49 : vector<8xf32> to vector<8x1xf32>
    %51 = vector.broadcast %50 : vector<8x1xf32> to vector<8x8xf32>
    %52 = arith.subf %48, %51 : vector<8x8xf32>
    %53 = math.exp %52 : vector<8x8xf32>
    %cst_20 = arith.constant dense<0.000000e+00> : vector<8xf32>
    %54 = vector.multi_reduction <add>, %53, %cst_20 [1] : vector<8x8xf32> to vector<8xf32>
    %55 = vector.shape_cast %54 : vector<8xf32> to vector<8x1xf32>
    %56 = vector.broadcast %55 : vector<8x1xf32> to vector<8x8xf32>
    %57 = arith.divf %53, %56 : vector<8x8xf32>
    %cst_21 = arith.constant dense<0.000000e+00> : vector<8x8xf32>
    %58 = tpu.matmul %57, %47, %cst_21 {dimension_numbers = #tpu.dot_dimension_numbers<[1], [0], [0], [1], [0, 0, 1, 1], [], []>, precision = #tpu.contract_precision<fp32>} : vector<8x8xf32>, vector<8x8xf32>, vector<8x8xf32> -> vector<8x8xf32>
    %c0_22 = arith.constant 0 : index
    %c8 = arith.constant 8 : index
    %59 = vector.load %arg12[%c0_22, %c8] : memref<16x32xf32, #tpu.memory_space<vmem>>, vector<8x8xf32>
    tpu.vector_store %arg12[%c0_22, %c8], %58 {strides = array<i32>} : memref<16x32xf32, #tpu.memory_space<vmem>>, vector<8x8xf32>,
    %60 = vector.extract_strided_slice %27 {offsets = [0, 16], sizes = [8, 8], strides = [1, 1]} : vector<16x32xf32> to vector<8x8xf32>
    %61 = vector.extract_strided_slice %28 {offsets = [0, 8], sizes = [8, 8], strides = [1, 1]} : vector<16x16xf32> to vector<8x8xf32>
    %62 = vector.extract_strided_slice %29 {offsets = [0, 8], sizes = [8, 8], strides = [1, 1]} : vector<16x16xf32> to vector<8x8xf32>
    %cst_23 = arith.constant dense<0.000000e+00> : vector<8x8xf32>
    %63 = tpu.matmul %60, %61, %cst_23 {dimension_numbers = #tpu.dot_dimension_numbers<[1], [1], [0], [0], [0, 0, 1, 0], [], []>, precision = #tpu.contract_precision<fp32>} : vector<8x8xf32>, vector<8x8xf32>, vector<8x8xf32> -> vector<8x8xf32>
    %cst_24 = arith.constant dense<0xFF800000> : vector<8xf32>
    %64 = vector.multi_reduction <maximumf>, %63, %cst_24 [1] : vector<8x8xf32> to vector<8xf32>
    %65 = vector.shape_cast %64 : vector<8xf32> to vector<8x1xf32>
    %66 = vector.broadcast %65 : vector<8x1xf32> to vector<8x8xf32>
    %67 = arith.subf %63, %66 : vector<8x8xf32>
    %68 = math.exp %67 : vector<8x8xf32>
    %cst_25 = arith.constant dense<0.000000e+00> : vector<8xf32>
    %69 = vector.multi_reduction <add>, %68, %cst_25 [1] : vector<8x8xf32> to vector<8xf32>
    %70 = vector.shape_cast %69 : vector<8xf32> to vector<8x1xf32>
    %71 = vector.broadcast %70 : vector<8x1xf32> to vector<8x8xf32>
    %72 = arith.divf %68, %71 : vector<8x8xf32>
    %cst_26 = arith.constant dense<0.000000e+00> : vector<8x8xf32>
    %73 = tpu.matmul %72, %62, %cst_26 {dimension_numbers = #tpu.dot_dimension_numbers<[1], [0], [0], [1], [0, 0, 1, 1], [], []>, precision = #tpu.contract_precision<fp32>} : vector<8x8xf32>, vector<8x8xf32>, vector<8x8xf32> -> vector<8x8xf32>
    %c0_27 = arith.constant 0 : index
    %c16 = arith.constant 16 : index
    %74 = vector.load %arg12[%c0_27, %c16] : memref<16x32xf32, #tpu.memory_space<vmem>>, vector<8x8xf32>
    tpu.vector_store %arg12[%c0_27, %c16], %73 {strides = array<i32>} : memref<16x32xf32, #tpu.memory_space<vmem>>, vector<8x8xf32>,
    %75 = vector.extract_strided_slice %27 {offsets = [0, 24], sizes = [8, 8], strides = [1, 1]} : vector<16x32xf32> to vector<8x8xf32>
    %76 = vector.extract_strided_slice %28 {offsets = [0, 8], sizes = [8, 8], strides = [1, 1]} : vector<16x16xf32> to vector<8x8xf32>
    %77 = vector.extract_strided_slice %29 {offsets = [0, 8], sizes = [8, 8], strides = [1, 1]} : vector<16x16xf32> to vector<8x8xf32>
    %cst_28 = arith.constant dense<0.000000e+00> : vector<8x8xf32>
    %78 = tpu.matmul %75, %76, %cst_28 {dimension_numbers = #tpu.dot_dimension_numbers<[1], [1], [0], [0], [0, 0, 1, 0], [], []>, precision = #tpu.contract_precision<fp32>} : vector<8x8xf32>, vector<8x8xf32>, vector<8x8xf32> -> vector<8x8xf32>
    %cst_29 = arith.constant dense<0xFF800000> : vector<8xf32>
    %79 = vector.multi_reduction <maximumf>, %78, %cst_29 [1] : vector<8x8xf32> to vector<8xf32>
    %80 = vector.shape_cast %79 : vector<8xf32> to vector<8x1xf32>
    %81 = vector.broadcast %80 : vector<8x1xf32> to vector<8x8xf32>
    %82 = arith.subf %78, %81 : vector<8x8xf32>
    %83 = math.exp %82 : vector<8x8xf32>
    %cst_30 = arith.constant dense<0.000000e+00> : vector<8xf32>
    %84 = vector.multi_reduction <add>, %83, %cst_30 [1] : vector<8x8xf32> to vector<8xf32>
    %85 = vector.shape_cast %84 : vector<8xf32> to vector<8x1xf32>
    %86 = vector.broadcast %85 : vector<8x1xf32> to vector<8x8xf32>
    %87 = arith.divf %83, %86 : vector<8x8xf32>
    %cst_31 = arith.constant dense<0.000000e+00> : vector<8x8xf32>
    %88 = tpu.matmul %87, %77, %cst_31 {dimension_numbers = #tpu.dot_dimension_numbers<[1], [0], [0], [1], [0, 0, 1, 1], [], []>, precision = #tpu.contract_precision<fp32>} : vector<8x8xf32>, vector<8x8xf32>, vector<8x8xf32> -> vector<8x8xf32>
    %c0_32 = arith.constant 0 : index
    %c24 = arith.constant 24 : index
    %89 = vector.load %arg12[%c0_32, %c24] : memref<16x32xf32, #tpu.memory_space<vmem>>, vector<8x8xf32>
    tpu.vector_store %arg12[%c0_32, %c24], %88 {strides = array<i32>} : memref<16x32xf32, #tpu.memory_space<vmem>>, vector<8x8xf32>,
    %90 = vector.extract_strided_slice %27 {offsets = [8, 0], sizes = [8, 8], strides = [1, 1]} : vector<16x32xf32> to vector<8x8xf32>
    %91 = vector.extract_strided_slice %28 {offsets = [8, 0], sizes = [8, 8], strides = [1, 1]} : vector<16x16xf32> to vector<8x8xf32>
    %92 = vector.extract_strided_slice %29 {offsets = [8, 0], sizes = [8, 8], strides = [1, 1]} : vector<16x16xf32> to vector<8x8xf32>
    %cst_33 = arith.constant dense<0.000000e+00> : vector<8x8xf32>
    %93 = tpu.matmul %90, %91, %cst_33 {dimension_numbers = #tpu.dot_dimension_numbers<[1], [1], [0], [0], [0, 0, 1, 0], [], []>, precision = #tpu.contract_precision<fp32>} : vector<8x8xf32>, vector<8x8xf32>, vector<8x8xf32> -> vector<8x8xf32>
    %cst_34 = arith.constant dense<0xFF800000> : vector<8xf32>
    %94 = vector.multi_reduction <maximumf>, %93, %cst_34 [1] : vector<8x8xf32> to vector<8xf32>
    %95 = vector.shape_cast %94 : vector<8xf32> to vector<8x1xf32>
    %96 = vector.broadcast %95 : vector<8x1xf32> to vector<8x8xf32>
    %97 = arith.subf %93, %96 : vector<8x8xf32>
    %98 = math.exp %97 : vector<8x8xf32>
    %cst_35 = arith.constant dense<0.000000e+00> : vector<8xf32>
    %99 = vector.multi_reduction <add>, %98, %cst_35 [1] : vector<8x8xf32> to vector<8xf32>
    %100 = vector.shape_cast %99 : vector<8xf32> to vector<8x1xf32>
    %101 = vector.broadcast %100 : vector<8x1xf32> to vector<8x8xf32>
    %102 = arith.divf %98, %101 : vector<8x8xf32>
    %cst_36 = arith.constant dense<0.000000e+00> : vector<8x8xf32>
    %103 = tpu.matmul %102, %92, %cst_36 {dimension_numbers = #tpu.dot_dimension_numbers<[1], [0], [0], [1], [0, 0, 1, 1], [], []>, precision = #tpu.contract_precision<fp32>} : vector<8x8xf32>, vector<8x8xf32>, vector<8x8xf32> -> vector<8x8xf32>
    %c8_37 = arith.constant 8 : index
    %c0_38 = arith.constant 0 : index
    %104 = vector.load %arg12[%c8_37, %c0_38] : memref<16x32xf32, #tpu.memory_space<vmem>>, vector<8x8xf32>
    tpu.vector_store %arg12[%c8_37, %c0_38], %103 {strides = array<i32>} : memref<16x32xf32, #tpu.memory_space<vmem>>, vector<8x8xf32>,
    %105 = vector.extract_strided_slice %27 {offsets = [8, 8], sizes = [8, 8], strides = [1, 1]} : vector<16x32xf32> to vector<8x8xf32>
    %106 = vector.extract_strided_slice %28 {offsets = [8, 0], sizes = [8, 8], strides = [1, 1]} : vector<16x16xf32> to vector<8x8xf32>
    %107 = vector.extract_strided_slice %29 {offsets = [8, 0], sizes = [8, 8], strides = [1, 1]} : vector<16x16xf32> to vector<8x8xf32>
    %cst_39 = arith.constant dense<0.000000e+00> : vector<8x8xf32>
    %108 = tpu.matmul %105, %106, %cst_39 {dimension_numbers = #tpu.dot_dimension_numbers<[1], [1], [0], [0], [0, 0, 1, 0], [], []>, precision = #tpu.contract_precision<fp32>} : vector<8x8xf32>, vector<8x8xf32>, vector<8x8xf32> -> vector<8x8xf32>
    %cst_40 = arith.constant dense<0xFF800000> : vector<8xf32>
    %109 = vector.multi_reduction <maximumf>, %108, %cst_40 [1] : vector<8x8xf32> to vector<8xf32>
    %110 = vector.shape_cast %109 : vector<8xf32> to vector<8x1xf32>
    %111 = vector.broadcast %110 : vector<8x1xf32> to vector<8x8xf32>
    %112 = arith.subf %108, %111 : vector<8x8xf32>
    %113 = math.exp %112 : vector<8x8xf32>
    %cst_41 = arith.constant dense<0.000000e+00> : vector<8xf32>
    %114 = vector.multi_reduction <add>, %113, %cst_41 [1] : vector<8x8xf32> to vector<8xf32>
    %115 = vector.shape_cast %114 : vector<8xf32> to vector<8x1xf32>
    %116 = vector.broadcast %115 : vector<8x1xf32> to vector<8x8xf32>
    %117 = arith.divf %113, %116 : vector<8x8xf32>
    %cst_42 = arith.constant dense<0.000000e+00> : vector<8x8xf32>
    %118 = tpu.matmul %117, %107, %cst_42 {dimension_numbers = #tpu.dot_dimension_numbers<[1], [0], [0], [1], [0, 0, 1, 1], [], []>, precision = #tpu.contract_precision<fp32>} : vector<8x8xf32>, vector<8x8xf32>, vector<8x8xf32> -> vector<8x8xf32>
    %c8_43 = arith.constant 8 : index
    %c8_44 = arith.constant 8 : index
    %119 = vector.load %arg12[%c8_43, %c8_44] : memref<16x32xf32, #tpu.memory_space<vmem>>, vector<8x8xf32>
    tpu.vector_store %arg12[%c8_43, %c8_44], %118 {strides = array<i32>} : memref<16x32xf32, #tpu.memory_space<vmem>>, vector<8x8xf32>,
    %120 = vector.extract_strided_slice %27 {offsets = [8, 16], sizes = [8, 8], strides = [1, 1]} : vector<16x32xf32> to vector<8x8xf32>
    %121 = vector.extract_strided_slice %28 {offsets = [8, 8], sizes = [8, 8], strides = [1, 1]} : vector<16x16xf32> to vector<8x8xf32>
    %122 = vector.extract_strided_slice %29 {offsets = [8, 8], sizes = [8, 8], strides = [1, 1]} : vector<16x16xf32> to vector<8x8xf32>
    %cst_45 = arith.constant dense<0.000000e+00> : vector<8x8xf32>
    %123 = tpu.matmul %120, %121, %cst_45 {dimension_numbers = #tpu.dot_dimension_numbers<[1], [1], [0], [0], [0, 0, 1, 0], [], []>, precision = #tpu.contract_precision<fp32>} : vector<8x8xf32>, vector<8x8xf32>, vector<8x8xf32> -> vector<8x8xf32>
    %cst_46 = arith.constant dense<0xFF800000> : vector<8xf32>
    %124 = vector.multi_reduction <maximumf>, %123, %cst_46 [1] : vector<8x8xf32> to vector<8xf32>
    %125 = vector.shape_cast %124 : vector<8xf32> to vector<8x1xf32>
    %126 = vector.broadcast %125 : vector<8x1xf32> to vector<8x8xf32>
    %127 = arith.subf %123, %126 : vector<8x8xf32>
    %128 = math.exp %127 : vector<8x8xf32>
    %cst_47 = arith.constant dense<0.000000e+00> : vector<8xf32>
    %129 = vector.multi_reduction <add>, %128, %cst_47 [1] : vector<8x8xf32> to vector<8xf32>
    %130 = vector.shape_cast %129 : vector<8xf32> to vector<8x1xf32>
    %131 = vector.broadcast %130 : vector<8x1xf32> to vector<8x8xf32>
    %132 = arith.divf %128, %131 : vector<8x8xf32>
    %cst_48 = arith.constant dense<0.000000e+00> : vector<8x8xf32>
    %133 = tpu.matmul %132, %122, %cst_48 {dimension_numbers = #tpu.dot_dimension_numbers<[1], [0], [0], [1], [0, 0, 1, 1], [], []>, precision = #tpu.contract_precision<fp32>} : vector<8x8xf32>, vector<8x8xf32>, vector<8x8xf32> -> vector<8x8xf32>
    %c8_49 = arith.constant 8 : index
    %c16_50 = arith.constant 16 : index
    %134 = vector.load %arg12[%c8_49, %c16_50] : memref<16x32xf32, #tpu.memory_space<vmem>>, vector<8x8xf32>
    tpu.vector_store %arg12[%c8_49, %c16_50], %133 {strides = array<i32>} : memref<16x32xf32, #tpu.memory_space<vmem>>, vector<8x8xf32>,
    %135 = vector.extract_strided_slice %27 {offsets = [8, 24], sizes = [8, 8], strides = [1, 1]} : vector<16x32xf32> to vector<8x8xf32>
    %136 = vector.extract_strided_slice %28 {offsets = [8, 8], sizes = [8, 8], strides = [1, 1]} : vector<16x16xf32> to vector<8x8xf32>
    %137 = vector.extract_strided_slice %29 {offsets = [8, 8], sizes = [8, 8], strides = [1, 1]} : vector<16x16xf32> to vector<8x8xf32>
    %cst_51 = arith.constant dense<0.000000e+00> : vector<8x8xf32>
    %138 = tpu.matmul %135, %136, %cst_51 {dimension_numbers = #tpu.dot_dimension_numbers<[1], [1], [0], [0], [0, 0, 1, 0], [], []>, precision = #tpu.contract_precision<fp32>} : vector<8x8xf32>, vector<8x8xf32>, vector<8x8xf32> -> vector<8x8xf32>
    %cst_52 = arith.constant dense<0xFF800000> : vector<8xf32>
    %139 = vector.multi_reduction <maximumf>, %138, %cst_52 [1] : vector<8x8xf32> to vector<8xf32>
    %140 = vector.shape_cast %139 : vector<8xf32> to vector<8x1xf32>
    %141 = vector.broadcast %140 : vector<8x1xf32> to vector<8x8xf32>
    %142 = arith.subf %138, %141 : vector<8x8xf32>
    %143 = math.exp %142 : vector<8x8xf32>
    %cst_53 = arith.constant dense<0.000000e+00> : vector<8xf32>
    %144 = vector.multi_reduction <add>, %143, %cst_53 [1] : vector<8x8xf32> to vector<8xf32>
    %145 = vector.shape_cast %144 : vector<8xf32> to vector<8x1xf32>
    %146 = vector.broadcast %145 : vector<8x1xf32> to vector<8x8xf32>
    %147 = arith.divf %143, %146 : vector<8x8xf32>
    %cst_54 = arith.constant dense<0.000000e+00> : vector<8x8xf32>
    %148 = tpu.matmul %147, %137, %cst_54 {dimension_numbers = #tpu.dot_dimension_numbers<[1], [0], [0], [1], [0, 0, 1, 1], [], []>, precision = #tpu.contract_precision<fp32>} : vector<8x8xf32>, vector<8x8xf32>, vector<8x8xf32> -> vector<8x8xf32>
    %c8_55 = arith.constant 8 : index
    %c24_56 = arith.constant 24 : index
    %149 = vector.load %arg12[%c8_55, %c24_56] : memref<16x32xf32, #tpu.memory_space<vmem>>, vector<8x8xf32>
    tpu.vector_store %arg12[%c8_55, %c24_56], %148 {strides = array<i32>} : memref<16x32xf32, #tpu.memory_space<vmem>>, vector<8x8xf32>,
    %c0_57 = arith.constant 0 : index
    %c0_58 = arith.constant 0 : index
    %150 = vector.load %arg12[%c0_57, %c0_58] : memref<16x32xf32, #tpu.memory_space<vmem>>, vector<16x32xf32>
    %c0_59 = arith.constant 0 : index
    %c0_60 = arith.constant 0 : index
    %151 = vector.load %arg4[%c0_59, %c0_60] : memref<32x32xf32, #tpu.memory_space<vmem>>, vector<32x32xf32>
    %cst_61 = arith.constant dense<0.000000e+00> : vector<16x32xf32>
    %152 = tpu.matmul %150, %151, %cst_61 {dimension_numbers = #tpu.dot_dimension_numbers<[1], [0], [0], [1], [0, 0, 1, 1], [], []>, precision = #tpu.contract_precision<fp32>} : vector<16x32xf32>, vector<32x32xf32>, vector<16x32xf32> -> vector<16x32xf32>
    %153 = arith.addf %0, %152 : vector<16x32xf32>
    %c0_62 = arith.constant 0 : index
    %c0_63 = arith.constant 0 : index
    %154 = vector.load %arg5[%c0_62, %c0_63] : memref<1x32xf32, #tpu.memory_space<vmem>>, vector<1x32xf32>
    %c0_64 = arith.constant 0 : index
    %c0_65 = arith.constant 0 : index
    %155 = vector.load %arg6[%c0_64, %c0_65] : memref<1x32xf32, #tpu.memory_space<vmem>>, vector<1x32xf32>
    %cst_66 = arith.constant dense<0.000000e+00> : vector<16xf32>
    %156 = vector.multi_reduction <add>, %153, %cst_66 [1] : vector<16x32xf32> to vector<16xf32>
    %157 = vector.shape_cast %156 : vector<16xf32> to vector<16x1xf32>
    %cst_67 = arith.constant 3.200000e+01 : f32
    %158 = vector.broadcast %cst_67 : f32 to vector<16x1xf32>
    %159 = arith.divf %157, %158 : vector<16x1xf32>
    %160 = vector.broadcast %159 : vector<16x1xf32> to vector<16x32xf32>
    %161 = arith.subf %153, %160 : vector<16x32xf32>
    %162 = arith.mulf %161, %161 : vector<16x32xf32>
    %cst_68 = arith.constant dense<0.000000e+00> : vector<16xf32>
    %163 = vector.multi_reduction <add>, %162, %cst_68 [1] : vector<16x32xf32> to vector<16xf32>
    %164 = vector.shape_cast %163 : vector<16xf32> to vector<16x1xf32>
    %cst_69 = arith.constant 3.200000e+01 : f32
    %165 = vector.broadcast %cst_69 : f32 to vector<16x1xf32>
    %166 = arith.divf %164, %165 : vector<16x1xf32>
    %167 = vector.broadcast %159 : vector<16x1xf32> to vector<16x32xf32>
    %168 = arith.subf %153, %167 : vector<16x32xf32>
    %cst_70 = arith.constant 9.99999974E-6 : f32
    %169 = vector.broadcast %cst_70 : f32 to vector<16x1xf32>
    %170 = arith.addf %166, %169 : vector<16x1xf32>
    %171 = math.rsqrt %170 : vector<16x1xf32>
    %172 = vector.broadcast %171 : vector<16x1xf32> to vector<16x32xf32>
    %173 = arith.mulf %168, %172 : vector<16x32xf32>
    %174 = vector.broadcast %154 : vector<1x32xf32> to vector<16x32xf32>
    %175 = arith.mulf %173, %174 : vector<16x32xf32>
    %176 = vector.broadcast %155 : vector<1x32xf32> to vector<16x32xf32>
    %177 = arith.addf %175, %176 : vector<16x32xf32>
    %c0_71 = arith.constant 0 : index
    %c0_72 = arith.constant 0 : index
    %178 = vector.load %arg7[%c0_71, %c0_72] : memref<32x64xf32, #tpu.memory_space<vmem>>, vector<32x64xf32>
    %cst_73 = arith.constant dense<0.000000e+00> : vector<16x64xf32>
    %179 = tpu.matmul %177, %178, %cst_73 {dimension_numbers = #tpu.dot_dimension_numbers<[1], [0], [0], [1], [0, 0, 1, 1], [], []>, precision = #tpu.contract_precision<fp32>} : vector<16x32xf32>, vector<32x64xf32>, vector<16x64xf32> -> vector<16x64xf32>
    %c0_74 = arith.constant 0 : index
    %c0_75 = arith.constant 0 : index
    %180 = vector.load %arg8[%c0_74, %c0_75] : memref<1x64xf32, #tpu.memory_space<vmem>>, vector<1x64xf32>
    %181 = vector.broadcast %180 : vector<1x64xf32> to vector<16x64xf32>
    %182 = arith.addf %179, %181 : vector<16x64xf32>
    %183 = arith.mulf %182, %182 : vector<16x64xf32>
    %184 = arith.mulf %182, %183 : vector<16x64xf32>
    %cst_76 = arith.constant 4.471500e-02 : f32
    %185 = vector.broadcast %cst_76 : f32 to vector<16x64xf32>
    %186 = arith.mulf %185, %184 : vector<16x64xf32>
    %187 = arith.addf %182, %186 : vector<16x64xf32>
    %cst_77 = arith.constant 0.797884583 : f32
    %188 = vector.broadcast %cst_77 : f32 to vector<16x64xf32>
    %189 = arith.mulf %188, %187 : vector<16x64xf32>
    %190 = math.tanh %189 : vector<16x64xf32>
    %cst_78 = arith.constant 1.000000e+00 : f32
    %191 = vector.broadcast %cst_78 : f32 to vector<16x64xf32>
    %192 = arith.addf %191, %190 : vector<16x64xf32>
    %cst_79 = arith.constant 5.000000e-01 : f32
    %193 = vector.broadcast %cst_79 : f32 to vector<16x64xf32>
    %194 = arith.mulf %193, %192 : vector<16x64xf32>
    %195 = arith.mulf %182, %194 : vector<16x64xf32>
    %c0_80 = arith.constant 0 : index
    %c0_81 = arith.constant 0 : index
    %196 = vector.load %arg9[%c0_80, %c0_81] : memref<64x32xf32, #tpu.memory_space<vmem>>, vector<64x32xf32>
    %cst_82 = arith.constant dense<0.000000e+00> : vector<16x32xf32>
    %197 = tpu.matmul %195, %196, %cst_82 {dimension_numbers = #tpu.dot_dimension_numbers<[1], [0], [0], [1], [0, 0, 1, 1], [], []>, precision = #tpu.contract_precision<fp32>} : vector<16x64xf32>, vector<64x32xf32>, vector<16x32xf32> -> vector<16x32xf32>
    %c0_83 = arith.constant 0 : index
    %c0_84 = arith.constant 0 : index
    %198 = vector.load %arg10[%c0_83, %c0_84] : memref<1x32xf32, #tpu.memory_space<vmem>>, vector<1x32xf32>
    %199 = vector.broadcast %198 : vector<1x32xf32> to vector<16x32xf32>
    %200 = arith.addf %197, %199 : vector<16x32xf32>
    %201 = arith.addf %153, %200 : vector<16x32xf32>
    %c0_85 = arith.constant 0 : index
    %c0_86 = arith.constant 0 : index
    %202 = vector.load %arg11[%c0_85, %c0_86] : memref<16x32xf32, #tpu.memory_space<vmem>>, vector<16x32xf32>
    tpu.vector_store %arg11[%c0_85, %c0_86], %201 {strides = array<i32>} : memref<16x32xf32, #tpu.memory_space<vmem>>, vector<16x32xf32>,
    return
  }
}

</mosaic_0001>

<bundles_post_ra>
// kernel: tpu_custom_call.1
= control target key start
LH: loop header
LB: loop body
LE: loop exit
PB: predicated region body
PF: predicated region fallthrough
CT: control target
= control target key end

     0   :  { %16 = vsyncpa [#allocation4], 0  ;;  %s12490_s0 = inlined_call_operand.hbm [shape: f32[16,32], index: 0, kind: input, shape index: {}]   ;;  %s12491_s1 = inlined_call_operand.vmem [shape: f32[1,32], index: 1, kind: input, shape index: {}]   ;;  %s12492_s2 = inlined_call_operand.vmem [shape: f32[1,32], index: 2, kind: input, shape index: {}]   ;;  %s12493_s3 = inlined_call_operand.vmem [shape: f32[32,64], index: 3, kind: input, shape index: {}]   ;;  %s12494_s4 = inlined_call_operand.vmem [shape: f32[32,32], index: 4, kind: input, shape index: {}]   ;;  %s12495_s5 = inlined_call_operand.hbm [shape: f32[1,32], index: 5, kind: input, shape index: {}]   ;;  %s12496_s6 = inlined_call_operand.hbm [shape: f32[1,32], index: 6, kind: input, shape index: {}]   ;;  %s12497_s7 = inlined_call_operand.vmem [shape: f32[32,64], index: 7, kind: input, shape index: {}]   ;;  %s12498_s8 = inlined_call_operand.hbm [shape: f32[1,64], index: 8, kind: input, shape index: {}]   ;;  %s12499_s9 = inlined_call_operand.vmem [shape: f32[64,32], index: 9, kind: input, shape index: {}]   ;;  %s12500_s10 = inlined_call_operand.vmem [shape: f32[1,32], index: 10, kind: input, shape index: {}]   ;;  %s12501_s11 = inlined_call_operand.hbm [shape: f32[16,32], index: 11, kind: output, shape index: {}]  }
   0x1   :  { %17 = vsyncpa [#allocation7], 0 }
   0x2   :  { %18 = vsyncpa [#allocation10], 0 }
   0x3   :  { %19 = vsyncpa [#allocation5], 0  ;;  %s11574_s17 = smov [#allocation6]   ;;  %s11575_s19 = smov [#allocation3]  }
   0x4   :  { %s46_s18 = sshll.u32 %s11574_s17, 4  ;;  %s25_s20 = sshll.u32 %s11575_s19, 4  ;;  %s47_s18 = int_to_ptr.vmem [resolvable:$true] %s46_s18  ;;  %s11652_s20 = int_to_ptr.vmem [resolvable:$true] %s25_s20 }
   0x5   :  { %s11456_s23 = scalar_lea.hbm %s12495_s5, 16 }
   0x6   :  { %p11457_p0 = scmp.ne.s32.totalorder %s12495_s5, %s11456_s23  ;;  %p11460_p1 = scmp.lt.u32.totalorder %s11456_s23, %s12495_s5 }
   0x8   :  { %p11462_p2 = pnand %p11460_p1, %p11457_p0 }
   0xa   :  { %11465 = shalt.err (!%p11462_p2)
}
   0xb   :  { %s11466_s28 = scalar_lea.vmem %s47_s18, 16  ;;  %s11470_s29 = scalar_lea.vmem %s47_s18, 32 }
   0xc   :  { %p11467_p3 = scmp.ne.s32.totalorder %s47_s18, %s11466_s28  ;;  %p11471_p4 = scmp.lt.s32.totalorder %s47_s18, %s47_s18 }
   0xd   :  { %p11472_p5 = scmp.lt.s32.totalorder %s11470_s29, %s11466_s28 }
   0xf   :  { %p11473_p6 = por %p11472_p5, %p11471_p4 }
  0x11   :  { %p11474_p7 = pnand %p11473_p6, %p11467_p3 }
  0x13   :  { %11477 = shalt.err (!%p11474_p7)
}
  0x14   :  { %49 = dma.hbm_to_vmem [thread:$0]  %s12495_s5, 16, %s47_s18, [#allocation7]  }
  0x15   :  { %s11478_s15 = scalar_lea.hbm %s12490_s0, 256 }
  0x16   :  { %p11479_p8 = scmp.ne.s32.totalorder %s12490_s0, %s11478_s15  ;;  %p11482_p9 = scmp.lt.u32.totalorder %s11478_s15, %s12490_s0 }
  0x18   :  { %p11484_p10 = pnand %p11482_p9, %p11479_p8 }
  0x1a   :  { %11487 = shalt.err (!%p11484_p10)
}
  0x1b   :  { %s11488_s22 = scalar_lea.vmem %s11652_s20, 256  ;;  %p11493_p12 = scmp.lt.s32.totalorder %s11652_s20, %s11652_s20 }
  0x1c   :  { %p11489_p11 = scmp.ne.s32.totalorder %s11652_s20, %s11488_s22  ;;  %p11494_p13 = scmp.lt.s32.totalorder %s11488_s22, %s11488_s22 }
  0x1e   :  { %p11495_p0 = por %p11494_p13, %p11493_p12 }
  0x20   :  { %p11496_p1 = pnand %p11495_p0, %p11489_p11 }
  0x22   :  { %11499 = shalt.err (!%p11496_p1)
}
  0x23   :  { %s11576_s5 = smov 128   ;;  %s11577_s18 = smov 8  }
  0x24   :  { %31 = dma.hbm_to_vmem [thread:$0]  %s12490_s0, 256, %s11652_s20, [#allocation4], %s11576_s5, %s11576_s5, %s11577_s18  }
  0x25   :  { %s11578_s25 = smov [#allocation8]   ;;  %s11579_s27 = smov [#allocation9]  }
  0x26   :  { %s56_s26 = sshll.u32 %s11578_s25, 4  ;;  %s68_s28 = sshll.u32 %s11579_s27, 4  ;;  %s57_s26 = int_to_ptr.vmem [resolvable:$true] %s56_s26  ;;  %s69_s28 = int_to_ptr.vmem [resolvable:$true] %s68_s28 }
  0x27   :  { %s11500_s12 = scalar_lea.hbm %s12496_s6, 16 }
  0x28   :  { %p11501_p2 = scmp.ne.s32.totalorder %s12496_s6, %s11500_s12  ;;  %p11504_p3 = scmp.lt.u32.totalorder %s11500_s12, %s12496_s6 }
  0x2a   :  { %p11506_p4 = pnand %p11504_p3, %p11501_p2 }
  0x2c   :  { %11509 = shalt.err (!%p11506_p4)
}
  0x2d   :  { %s11510_s0 = scalar_lea.vmem %s57_s26, 16  ;;  %s11514_s20 = scalar_lea.vmem %s57_s26, 32 }
  0x2e   :  { %p11511_p5 = scmp.ne.s32.totalorder %s57_s26, %s11510_s0  ;;  %p11515_p6 = scmp.lt.s32.totalorder %s57_s26, %s57_s26 }
  0x2f   :  { %p11516_p7 = scmp.lt.s32.totalorder %s11514_s20, %s11510_s0 }
  0x31   :  { %p11517_p8 = por %p11516_p7, %p11515_p6 }
  0x33   :  { %p11518_p9 = pnand %p11517_p8, %p11511_p5 }
  0x35   :  { %11521 = shalt.err (!%p11518_p9)
}
  0x36   :  { %59 = dma.hbm_to_vmem [thread:$0]  %s12496_s6, 16, %s57_s26, [#allocation7]  }
  0x37   :  { %s11522_s23 = scalar_lea.hbm %s12498_s8, 16 }
  0x38   :  { %p11523_p10 = scmp.ne.s32.totalorder %s12498_s8, %s11522_s23  ;;  %p11526_p11 = scmp.lt.u32.totalorder %s11522_s23, %s12498_s8 }
  0x3a   :  { %p11528_p12 = pnand %p11526_p11, %p11523_p10 }
  0x3c   :  { %11531 = shalt.err (!%p11528_p12)
}
  0x3d   :  { %s11532_s30 = scalar_lea.vmem %s69_s28, 16  ;;  %s11536_s12 = scalar_lea.vmem %s69_s28, 32 }
  0x3e   :  { %p11533_p13 = scmp.ne.s32.totalorder %s69_s28, %s11532_s30  ;;  %p11537_p0 = scmp.lt.s32.totalorder %s69_s28, %s69_s28 }
  0x3f   :  { %p11538_p1 = scmp.lt.s32.totalorder %s11536_s12, %s11532_s30 }
  0x41   :  { %p11539_p2 = por %p11538_p1, %p11537_p0 }
  0x43   :  { %p11540_p3 = pnand %p11539_p2, %p11533_p13 }
  0x45   :  { %11543 = shalt.err (!%p11540_p3)
}
  0x46   :  { %71 = dma.hbm_to_vmem [thread:$0]  %s12498_s8, 16, %s69_s28, [#allocation10]  }
  0x47   :  { %11566 = dma.done.wait [#allocation4], 256  }
  0x48   :  { %11567 = vsyncadd [#allocation4], 4294967040 }
  0x49   :  { %11568 = dma.done.wait [#allocation7], 32  }
  0x4a   :  { %11569 = vsyncadd [#allocation7], 4294967264 }
  0x4b   :  { %11570 = dma.done.wait [#allocation10], 16  }
  0x4c   :  { %11571 = vsyncadd [#allocation10], 4294967280  ;;  %vm92_vm0 = vcmask 261120   ;;  %v88_v0 = vld [vmem:[#allocation3] sm:$0xff]  ;;  %v89_v1 = vld [vmem:[#allocation3 + $0x8] sm:$0xff]  ;;  %vm11581_vm1 = vmmov 0  }
  0x4d   :  { %v93_v2 = vsel %vm92_vm0, %v88_v0, 0.0  ;;  %v96_v3 = vsel %vm92_vm0, %v89_v1, 0.0  ;;  %v136_v14 = vld [vmem:[%s12493_s3] sm:$0xff]  ;;  %v137_v15 = vld [vmem:[%s12493_s3 + $0x8] sm:$0xff]  ;;  %v138_v16 = vld [vmem:[%s12493_s3 + $0x10] sm:$0xff]  ;;  %s11584_s22 = smov 112  }
  0x4e   :  { %94 = vadd.xlane.f32.xlu0 %v93_v2  ;;  %v147_v17 = vand.u32 4294901760, %v136_v14  ;;  %v150_v18 = vand.u32 4294901760, %v137_v15  ;;  %v139_v19 = vld [vmem:[%s12493_s3 + $0x18] sm:$0xff]  ;;  %v153_v20 = vand.u32 4294901760, %v138_v16  ;;  %v9790_v53 = vld [vmem:[%s12491_s1] ss:$0 sm:$0xff] }
  0x4f   :  { %v156_v21 = vand.u32 4294901760, %v139_v19  ;;  %v9791_v55 = vld [vmem:[%s12492_s2] ss:$0 sm:$0xff]  ;;  %s11582_s1 = smov 120   ;;  %s11583_s2 = smov 96   ;;  %vm677_vm2 = vcmask 64512  }
  0x50   :  { %v11726_v22 = vpack.c.bf16 %v150_v18, %v147_v17  ;;  %v237_v24 = vsub.f32 %v136_v14, %v147_v17  ;;  %v244_v25 = vsub.f32 %v137_v15, %v150_v18  ;;  %v251_v30 = vsub.f32 %v138_v16, %v153_v20  ;;  %s11585_s23 = smov 104   ;;  %s11586_s24 = smov 88  }
  0x51   :  { %v11728_v23 = vpack.c.bf16 %v156_v21, %v153_v20  ;;  %v258_v31 = vsub.f32 %v139_v19, %v156_v21  ;;  %s11587_s25 = smov 80   ;;  %s11588_s27 = smov 72   ;;  %vm2506_vm3 = vcmask 130112   ;;  %vm3429_vm4 = vcmask 195712  }
  0x52   :  { %97 = vadd.xlane.f32.xlu0 %v96_v3  ;;  %10949 = vmatprep.subr.bf16.mxu0 %v11726_v22  ;;  %v238_v26 = vand.u32 4294901760, %v237_v24  ;;  %v245_v27 = vand.u32 4294901760, %v244_v25  ;;  %v252_v34 = vand.u32 4294901760, %v251_v30  ;;  %v10964_v42 = vpack.c.bf16 %v244_v25, %v237_v24  ;;  %s11589_s29 = smov 16   ;;  %s11590_s30 = smov 24  }
  0x53   :  { %10951 = vmatpush3.bf16.msra.mxu0 %v11726_v22  ;;  %v259_v35 = vand.u32 4294901760, %v258_v31  ;;  %v10968_v43 = vpack.c.bf16 %v258_v31, %v251_v30  ;;  %vm4345_vm5 = vcmask 261312   ;;  %vm9180_vm6 = vcmask 523264   ;;  %s11591_s15 = smov [#allocation11]  }
  0x54   :  { %10953 = vmatprep.subr.bf16.mxu0 %v11728_v23  ;;  %v239_v28 = vsub.f32 %v237_v24, %v238_v26  ;;  %v246_v29 = vsub.f32 %v244_v25, %v245_v27  ;;  %v253_v37 = vsub.f32 %v251_v30, %v252_v34  ;;  %v10980_v44 = vpack.c.bf16 %v245_v27, %v238_v26 }
  0x55   :  { %v260_v38 = vsub.f32 %v258_v31, %v259_v35  ;;  %v10984_v45 = vpack.c.bf16 %v259_v35, %v252_v34 }
  0x56   :  { %v240_v32 = vand.u32 4294901760, %v239_v28  ;;  %v247_v33 = vand.u32 4294901760, %v246_v29  ;;  %v254_v39 = vand.u32 4294901760, %v253_v37 }
  0x57   :  { %10955 = vmatpush3.bf16.msra.mxu0 %v11728_v23  ;;  %v261_v40 = vand.u32 4294901760, %v260_v38 }
  0x58   :  { %v10956_v36 = vpack.c.bf16 %v247_v33, %v240_v32 }
  0x59   :  { %v10960_v41 = vpack.c.bf16 %v261_v40, %v254_v39 }
  0x5a   :  { %10957 = vmatprep.subr.bf16.mxu0 %v10956_v36 }
  0xdb   :  { %v95_v4 = vpop.xlane.xlu0 %94 }
  0xdc   :  { %v100_v5 = vmul.f32 0.03125, %v95_v4 }
  0xde   :  { %v102_v6 = vsub.f32 %v88_v0, %v100_v5 }
  0xdf   :  { %v98_v7 = vpop.xlane.xlu0 %97 }
  0xe0   :  { %v101_v8 = vmul.f32 0.03125, %v98_v7  ;;  %v104_v9 = vmul.f32 %v102_v6, %v102_v6 }
  0xe2   :  { %v103_v10 = vsub.f32 %v89_v1, %v101_v8  ;;  %v106_v11 = vsel %vm92_vm0, %v104_v9, 0.0 }
  0xe3   :  { %107 = vadd.xlane.f32.xlu1 %v106_v11 }
  0xe4   :  { %v105_v12 = vmul.f32 %v103_v10, %v103_v10 }
  0xe6   :  { %v109_v13 = vsel %vm92_vm0, %v105_v12, 0.0 }
  0xe7   :  { %110 = vadd.xlane.f32.xlu1 %v109_v13 }
 0x170   :  { %v108_v46 = vpop.xlane.xlu1 %107 }
 0x171   :  { %v112_v47 = vmul.f32 0.03125, %v108_v46 }
 0x173   :  { %v114_v48 = vadd.f32 1e-05, %v112_v47 }
 0x174   :  { %v111_v49 = vpop.xlane.xlu1 %110 }
 0x175   :  { %11410 = vrsqrt.f32 %v114_v48  ;;  %v113_v50 = vmul.f32 0.03125, %v111_v49 }
 0x177   :  { %v115_v51 = vadd.f32 1e-05, %v113_v50 }
 0x179   :  { %11412 = vrsqrt.f32 %v115_v51 }
 0x17f   :  { %v11411_v52 = vpop.eup %11410 }
 0x180   :  { %v118_v54 = vmul.f32 %v11411_v52, %v102_v6 }
 0x182   :  { %v126_v56 = vmul.f32 %v9790_v53, %v118_v54 }
 0x183   :  { %v11413_v57 = vpop.eup %11412 }
 0x184   :  { %v119_v58 = vmul.f32 %v11413_v57, %v103_v10  ;;  %v134_v59 = vadd.f32 %v9791_v55, %v126_v56  ;;  %v11580_v10 = vmov 0.0  }
 0x185   :  { %10222 = vmatprep.subr.mxu1 %v11580_v10  ;;  %10224 = vmatprep.mubr.msk.f32.mxu1 %vm11581_vm1, %v11580_v10 }
 0x186   :  { %v127_v60 = vmul.f32 %v9790_v53, %v119_v58  ;;  %v141_v61 = vsel %vm92_vm0, %v134_v59, 0 }
 0x187   :  { %v215_v62 = vand.u32 4294901760, %v141_v61 }
 0x188   :  { %v135_v63 = vadd.f32 %v9791_v55, %v127_v60 }
 0x189   :  { %v216_v0 = vsub.f32 %v141_v61, %v215_v62 }
 0x18a   :  { %v144_v1 = vsel %vm92_vm0, %v135_v63, 0 }
 0x18b   :  { %v217_v2 = vand.u32 4294901760, %v216_v0  ;;  %v225_v3 = vand.u32 4294901760, %v144_v1 }
 0x18d   :  { %v218_v4 = vsub.f32 %v216_v0, %v217_v2  ;;  %v226_v5 = vsub.f32 %v144_v1, %v225_v3 }
 0x18f   :  { %v219_v6 = vand.u32 4294901760, %v218_v4  ;;  %v227_v7 = vand.u32 4294901760, %v226_v5 }
 0x191   :  { %10164 = vmatprep.mubr.f32.mxu0 %v219_v6  ;;  %v228_v8 = vsub.f32 %v226_v5, %v227_v7 }
 0x193   :  { %v229_v9 = vand.u32 4294901760, %v228_v8 }
 0x195   :  { %10165 = vmatmul.mubr.f32.vlgmr.msra.gmra.mrb[0].mxu0 %v229_v9 }
 0x196   :  { %10959 = vmatpush3.bf16.msra.mxu0 %v10956_v36  ;;  %10175 = vmatprep.mubr.f32.mxu0 %v215_v62 }
 0x197   :  { %10961 = vmatprep.subr.bf16.mxu0 %v10960_v41 }
 0x19a   :  { %10963 = vmatpush3.bf16.msra.mxu0 %v10960_v41 }
 0x19b   :  { %10965 = vmatprep.subr.bf16.mxu0 %v10964_v42 }
 0x19d   :  { %10176 = vmatmul.mubr.f32.vlgmr.msra.gmra.mrb[0].mxu0 %v225_v3 }
 0x19e   :  { %10967 = vmatpush3.bf16.msra.mxu0 %v10964_v42  ;;  %10186 = vmatprep.mubr.f32.mxu0 %v216_v0 }
 0x19f   :  { %10969 = vmatprep.subr.bf16.mxu0 %v10968_v43 }
 0x1a2   :  { %10971 = vmatpush3.bf16.msra.mxu0 %v10968_v43 }
 0x1a3   :  { %10973 = vmatprep.subr.bf16.mxu0 %v11726_v22 }
 0x1a5   :  { %10187 = vmatmul.mubr.f32.vlgmr.msra.gmra.mrb[0].mxu0 %v226_v5 }
 0x1a6   :  { %10975 = vmatpush3.bf16.msra.mxu0 %v11726_v22  ;;  %10197 = vmatprep.mubr.f32.mxu0 %v217_v2 }
 0x1a7   :  { %10977 = vmatprep.subr.bf16.mxu0 %v11728_v23 }
 0x1aa   :  { %10979 = vmatpush3.bf16.msra.mxu0 %v11728_v23 }
 0x1ab   :  { %10981 = vmatprep.subr.bf16.mxu0 %v10980_v44 }
 0x1ad   :  { %10198 = vmatmul.mubr.f32.vlgmr.msra.gmra.mrb[0].mxu0 %v227_v7 }
 0x1ae   :  { %10983 = vmatpush3.bf16.msra.mxu0 %v10980_v44  ;;  %10208 = vmatprep.mubr.f32.mxu0 %v215_v62 }
 0x1af   :  { %10985 = vmatprep.subr.bf16.mxu0 %v10984_v45 }
 0x1b2   :  { %10987 = vmatpush3.bf16.msra.mxu0 %v10984_v45 }
 0x1b3   :  { %10989 = vmatprep.subr.bf16.mxu0 %v11726_v22 }
 0x1b5   :  { %10209 = vmatmul.mubr.f32.vlgmr.msra.gmra.mrb[0].mxu0 %v225_v3 }
 0x1b6   :  { %10991 = vmatpush3.bf16.msra.mxu0 %v11726_v22  ;;  %10219 = vmatprep.mubr.f32.mxu0 %v215_v62 }
 0x1b7   :  { %10993 = vmatprep.subr.bf16.mxu0 %v11728_v23 }
 0x1ba   :  { %10995 = vmatpush3.bf16.msra.mxu0 %v11728_v23 }
 0x1bb   :  { %10282 = vmatprep.subr.mxu0 %v11580_v10 }
 0x1bd   :  { %10220 = vmatmul.mubr.f32.vlgmr.msra.gmra.mrb[0].mxu0 %v225_v3 }
 0x1be   :  { %10284 = vmatprep.mubr.msk.f32.mxu0 %vm11581_vm1, %v11580_v10 }
 0x290   :  { %v11756_v11 = vpop.f32.mrb[0].mxu0 }
 0x291   :  { %v11758_v12 = vpop.f32.mrb[1].mxu0  ;;  %v4350_v55 = vsel %vm677_vm2, %v11756_v11, 0 }
 0x292   :  { %1592 = vrot.lane.b32.xlu1 %v11758_v12, %s11582_s1  ;;  %675 = vrot.lane.b32.xlu0 %v11758_v12, %s11583_s2  ;;  %v678_v13 = vsel %vm677_vm2, %v11758_v12, 0  ;;  %v4420_v57 = vand.u32 4294901760, %v4350_v55 }
 0x293   :  { %v11772_v14 = vand.u32 4294901760, %v678_v13 }
 0x294   :  { %v4421_v59 = vsub.f32 %v4350_v55, %v4420_v57 }
 0x295   :  { %v749_v15 = vsub.f32 %v678_v13, %v11772_v14 }
 0x296   :  { %2508 = vrot.lane.b32.xlu1 %v11758_v12, %s11584_s22  ;;  %3431 = vrot.lane.b32.xlu0 %v11758_v12, %s11585_s23  ;;  %v4422_v61 = vand.u32 4294901760, %v4421_v59 }
 0x297   :  { %v750_v16 = vand.u32 4294901760, %v749_v15 }
 0x298   :  { %v4423_v63 = vsub.f32 %v4421_v59, %v4422_v61 }
 0x299   :  { %v751_v21 = vsub.f32 %v749_v15, %v750_v16 }
 0x29a   :  { %2510 = vrot.lane.b32.xlu1 %v11758_v12, %s11586_s24  ;;  %5264 = vrot.lane.b32.xlu0 %v11756_v11, %s11582_s1  ;;  %v4424_v1 = vand.u32 4294901760, %v4423_v63 }
 0x29b   :  { %v752_v26 = vand.u32 4294901760, %v751_v21 }
 0x29e   :  { %4348 = vrot.lane.b32.xlu1 %v11756_v11, %s11583_s2  ;;  %6181 = vrot.lane.b32.xlu0 %v11756_v11, %s11586_s24 }
 0x2a2   :  { %6179 = vrot.lane.b32.xlu1 %v11756_v11, %s11584_s22 }
 0x2a6   :  { %7101 = vrot.lane.b32.xlu1 %v11756_v11, %s11585_s23 }
 0x304   :  { %v1593_v17 = vpop.permute.xlu1 %1592  ;;  %v676_v18 = vpop.permute.xlu0 %675 }
 0x305   :  { %v1594_v19 = vsel %vm677_vm2, %v1593_v17, 0  ;;  %v680_v20 = vsel %vm677_vm2, %v676_v18, 0 }
 0x306   :  { %v11777_v22 = vand.u32 4294901760, %v1594_v19  ;;  %v683_v23 = vand.u32 4294901760, %v680_v20 }
 0x308   :  { %v1663_v24 = vsub.f32 %v1594_v19, %v11777_v22  ;;  %v760_v25 = vsub.f32 %v680_v20, %v683_v23  ;;  %10223 = vmatpush3.xpose.msra.mxu1 %v683_v23  ;;  %10283 = vmatpush3.xpose.msra.mxu0 %v683_v23  ;;  %v2509_v33 = vpop.permute.xlu1 %2508  ;;  %v3432_v47 = vpop.permute.xlu0 %3431 }
 0x309   :  { %10227 = vmatprep.subr.mxu1 %v11580_v10  ;;  %10287 = vmatprep.subr.mxu0 %v11580_v10  ;;  %v2512_v35 = vsel %vm677_vm2, %v2509_v33, 0  ;;  %v3433_v48 = vsel %vm677_vm2, %v3432_v47, 0 }
 0x30a   :  { %v1664_v27 = vand.u32 4294901760, %v1663_v24  ;;  %v761_v28 = vand.u32 4294901760, %v760_v25  ;;  %v2582_v37 = vand.u32 4294901760, %v2512_v35  ;;  %v3501_v49 = vand.u32 4294901760, %v3433_v48 }
 0x30b   :  { %10225 = vmatmul.mubr.f32.vlgmr.msra.gmra.mrb[0].mxu1 %v752_v26 }
 0x30c   :  { %v1665_v29 = vsub.f32 %v1663_v24, %v1664_v27  ;;  %v762_v30 = vsub.f32 %v760_v25, %v761_v28  ;;  %10229 = vmatprep.mubr.msk.f32.mxu1 %vm11581_vm1, %v11580_v10  ;;  %v2511_v34 = vpop.permute.xlu1 %2510  ;;  %v2583_v39 = vsub.f32 %v2512_v35, %v2582_v37  ;;  %v3502_v50 = vsub.f32 %v3433_v48, %v3501_v49  ;;  %v5265_v3 = vpop.permute.xlu0 %5264 }
 0x30d   :  { %v2514_v36 = vsel %vm677_vm2, %v2511_v34, 0  ;;  %v5266_v4 = vsel %vm677_vm2, %v5265_v3, 0 }
 0x30e   :  { %v1666_v31 = vand.u32 4294901760, %v1665_v29  ;;  %v763_v32 = vand.u32 4294901760, %v762_v30  ;;  %v11810_v38 = vand.u32 4294901760, %v2514_v36  ;;  %v2584_v41 = vand.u32 4294901760, %v2583_v39 }
 0x30f   :  { %v3503_v51 = vand.u32 4294901760, %v3502_v50  ;;  %v5334_v5 = vand.u32 4294901760, %v5266_v4 }
 0x310   :  { %10285 = vmatmul.mubr.f32.vlgmr.msra.gmra.mrb[2].mxu0 %v1666_v31  ;;  %10228 = vmatpush3.xpose.msra.mxu1 %v763_v32  ;;  %v2594_v40 = vsub.f32 %v2514_v36, %v11810_v38  ;;  %v2585_v43 = vsub.f32 %v2583_v39, %v2584_v41  ;;  %v4349_v54 = vpop.permute.xlu1 %4348 }
 0x311   :  { %10288 = vmatpush3.xpose.msra.mxu0 %v763_v32  ;;  %10232 = vmatprep.subr.mxu1 %v11580_v10  ;;  %v3504_v52 = vsub.f32 %v3502_v50, %v3503_v51  ;;  %v4352_v56 = vsel %vm677_vm2, %v4349_v54, 0  ;;  %v5335_v6 = vsub.f32 %v5266_v4, %v5334_v5 }
 0x312   :  { %10289 = vmatprep.mubr.msk.f32.mxu0 %vm11581_vm1, %v11580_v10  ;;  %10292 = vmatprep.subr.mxu0 %v11580_v10  ;;  %v2595_v42 = vand.u32 4294901760, %v2594_v40  ;;  %v2586_v45 = vand.u32 4294901760, %v2585_v43  ;;  %v11867_v58 = vand.u32 4294901760, %v4352_v56 }
 0x313   :  { %10230 = vmatmul.mubr.f32.vlgmr.msra.gmra.mrb[0].mxu1 %v11772_v14  ;;  %v3505_v53 = vand.u32 4294901760, %v3504_v52  ;;  %v5336_v7 = vand.u32 4294901760, %v5335_v6 }
 0x314   :  { %10233 = vmatpush3.xpose.msra.mxu1 %v760_v25  ;;  %10234 = vmatprep.mubr.msk.f32.mxu1 %vm11581_vm1, %v11580_v10  ;;  %v2596_v44 = vsub.f32 %v2594_v40, %v2595_v42  ;;  %v4432_v60 = vsub.f32 %v4352_v56, %v11867_v58  ;;  %v6180_v13 = vpop.permute.xlu1 %6179 }
 0x315   :  { %10237 = vmatprep.subr.mxu1 %v11580_v10  ;;  %v5337_v8 = vsub.f32 %v5335_v6, %v5336_v7 }
 0x316   :  { %v2597_v46 = vand.u32 4294901760, %v2596_v44  ;;  %v4433_v62 = vand.u32 4294901760, %v4432_v60 }
 0x317   :  { %v5338_v9 = vand.u32 4294901760, %v5337_v8 }
 0x318   :  { %10290 = vmatmul.mubr.f32.vlgmr.msra.gmra.mrb[2].mxu0 %v11777_v22  ;;  %v4434_v0 = vsub.f32 %v4432_v60, %v4433_v62 }
 0x319   :  { %10293 = vmatpush3.xpose.msra.mxu0 %v760_v25  ;;  %10294 = vmatprep.mubr.msk.f32.mxu0 %vm11581_vm1, %v11580_v10 }
 0x31a   :  { %10297 = vmatprep.subr.mxu0 %v11580_v10  ;;  %v4435_v2 = vand.u32 4294901760, %v4434_v0 }
 0x31b   :  { %10235 = vmatmul.mubr.f32.vlgmr.msra.gmra.mrb[0].mxu1 %v749_v15  ;;  %v6183_v15 = vsel %vm677_vm2, %v6180_v13, 0 }
 0x31c   :  { %10238 = vmatpush3.xpose.msra.mxu1 %v683_v23  ;;  %10239 = vmatprep.mubr.msk.f32.mxu1 %vm11581_vm1, %v11580_v10  ;;  %v6253_v17 = vand.u32 4294901760, %v6183_v15 }
 0x31d   :  { %10242 = vmatprep.subr.mxu1 %v11580_v10 }
 0x31e   :  { %v6254_v19 = vsub.f32 %v6183_v15, %v6253_v17 }
 0x320   :  { %10295 = vmatmul.mubr.f32.vlgmr.msra.gmra.mrb[2].mxu0 %v1663_v24  ;;  %v6255_v21 = vand.u32 4294901760, %v6254_v19 }
 0x321   :  { %10298 = vmatpush3.xpose.msra.mxu0 %v683_v23  ;;  %10299 = vmatprep.mubr.msk.f32.mxu0 %vm11581_vm1, %v11580_v10 }
 0x322   :  { %10302 = vmatprep.subr.mxu0 %v11580_v10 }
 0x323   :  { %10240 = vmatmul.mubr.f32.vlgmr.msra.gmra.mrb[0].mxu1 %v750_v16 }
 0x324   :  { %10243 = vmatpush3.xpose.msra.mxu1 %v761_v28  ;;  %10244 = vmatprep.mubr.msk.f32.mxu1 %vm11581_vm1, %v11580_v10 }
 0x325   :  { %10247 = vmatprep.subr.mxu1 %v11580_v10 }
 0x328   :  { %10300 = vmatmul.mubr.f32.vlgmr.msra.gmra.mrb[2].mxu0 %v1664_v27  ;;  %v7102_v27 = vpop.permute.xlu1 %7101 }
 0x329   :  { %10303 = vmatpush3.xpose.msra.mxu0 %v761_v28  ;;  %10304 = vmatprep.mubr.msk.f32.mxu0 %vm11581_vm1, %v11580_v10  ;;  %v7103_v28 = vsel %vm677_vm2, %v7102_v27, 0 }
 0x32a   :  { %10307 = vmatprep.subr.mxu0 %v11580_v10  ;;  %v7171_v29 = vand.u32 4294901760, %v7103_v28 }
 0x32b   :  { %10245 = vmatmul.mubr.f32.vlgmr.msra.gmra.mrb[0].mxu1 %v11772_v14 }
 0x32c   :  { %10248 = vmatpush3.xpose.msra.mxu1 %v683_v23  ;;  %10249 = vmatprep.mubr.msk.f32.mxu1 %vm11581_vm1, %v11580_v10  ;;  %v7172_v33 = vsub.f32 %v7103_v28, %v7171_v29 }
 0x32d   :  { %10252 = vmatprep.subr.mxu1 %v11580_v10 }
 0x330   :  { %10305 = vmatmul.mubr.f32.vlgmr.msra.gmra.mrb[2].mxu0 %v11777_v22 }
 0x331   :  { %10308 = vmatpush3.xpose.msra.mxu0 %v683_v23  ;;  %10309 = vmatprep.mubr.msk.f32.mxu0 %vm11581_vm1, %v11580_v10  ;;  %v6256_v23 = vsub.f32 %v6254_v19, %v6255_v21 }
 0x332   :  { %10342 = vmatprep.subr.mxu0 %v11580_v10 }
 0x333   :  { %10250 = vmatmul.mubr.f32.vlgmr.msra.gmra.mrb[0].mxu1 %v11772_v14  ;;  %v6182_v14 = vpop.permute.xlu0 %6181  ;;  %v6257_v25 = vand.u32 4294901760, %v6256_v23 }
 0x334   :  { %10254 = vmatprep.mubr.msk.f32.mxu1 %vm11581_vm1, %v11580_v10  ;;  %v6185_v16 = vsel %vm677_vm2, %v6182_v14, 0 }
 0x335   :  { %v11915_v18 = vand.u32 4294901760, %v6185_v16 }
 0x337   :  { %v6265_v20 = vsub.f32 %v6185_v16, %v11915_v18 }
 0x338   :  { %10310 = vmatmul.mubr.f32.vlgmr.msra.gmra.mrb[2].mxu0 %v11777_v22 }
 0x339   :  { %10343 = vmatpush3.xpose.msra.mxu0 %v11810_v38  ;;  %10344 = vmatprep.mubr.msk.f32.mxu0 %vm11581_vm1, %v11580_v10  ;;  %v6266_v22 = vand.u32 4294901760, %v6265_v20 }
 0x33a   :  { %10347 = vmatprep.subr.mxu0 %v11580_v10 }
 0x33b   :  { %v6267_v24 = vsub.f32 %v6265_v20, %v6266_v22 }
 0x33c   :  { %10345 = vmatmul.mubr.f32.vlgmr.msra.gmra.mrb[4].mxu0 %v2586_v45 }
 0x33d   :  { %10348 = vmatpush3.xpose.msra.mxu0 %v2597_v46  ;;  %10349 = vmatprep.mubr.msk.f32.mxu0 %vm11581_vm1, %v11580_v10  ;;  %v6268_v26 = vand.u32 4294901760, %v6267_v24 }
 0x33e   :  { %10352 = vmatprep.subr.mxu0 %v11580_v10 }
 0x344   :  { %10350 = vmatmul.mubr.f32.vlgmr.msra.gmra.mrb[4].mxu0 %v2582_v37 }
 0x345   :  { %10353 = vmatpush3.xpose.msra.mxu0 %v2594_v40  ;;  %10354 = vmatprep.mubr.msk.f32.mxu0 %vm11581_vm1, %v11580_v10 }
 0x346   :  { %10357 = vmatprep.subr.mxu0 %v11580_v10 }
 0x34c   :  { %10355 = vmatmul.mubr.f32.vlgmr.msra.gmra.mrb[4].mxu0 %v2583_v39 }
 0x34d   :  { %10358 = vmatpush3.xpose.msra.mxu0 %v11810_v38  ;;  %10359 = vmatprep.mubr.msk.f32.mxu0 %vm11581_vm1, %v11580_v10 }
 0x34e   :  { %10362 = vmatprep.subr.mxu0 %v11580_v10 }
 0x354   :  { %10360 = vmatmul.mubr.f32.vlgmr.msra.gmra.mrb[4].mxu0 %v2584_v41 }
 0x355   :  { %10363 = vmatpush3.xpose.msra.mxu0 %v2595_v42  ;;  %10364 = vmatprep.mubr.msk.f32.mxu0 %vm11581_vm1, %v11580_v10 }
 0x356   :  { %10367 = vmatprep.subr.mxu0 %v11580_v10 }
 0x35c   :  { %10365 = vmatmul.mubr.f32.vlgmr.msra.gmra.mrb[4].mxu0 %v2582_v37 }
 0x35d   :  { %10368 = vmatpush3.xpose.msra.mxu0 %v11810_v38  ;;  %10369 = vmatprep.mubr.msk.f32.mxu0 %vm11581_vm1, %v11580_v10 }
 0x35e   :  { %10402 = vmatprep.subr.mxu0 %v11580_v10 }
 0x364   :  { %10370 = vmatmul.mubr.f32.vlgmr.msra.gmra.mrb[4].mxu0 %v2582_v37  ;;  %v7173_v37 = vand.u32 4294901760, %v7172_v33 }
 0x365   :  { %10403 = vmatpush3.xpose.msra.mxu0 %v11810_v38  ;;  %10404 = vmatprep.mubr.msk.f32.mxu0 %vm11581_vm1, %v11580_v10 }
 0x366   :  { %10407 = vmatprep.subr.mxu0 %v11580_v10 }
 0x368   :  { %10405 = vmatmul.mubr.f32.vlgmr.msra.gmra.mrb[6].mxu0 %v3505_v53 }
 0x369   :  { %10408 = vmatpush3.xpose.msra.mxu0 %v2597_v46  ;;  %10409 = vmatprep.mubr.msk.f32.mxu0 %vm11581_vm1, %v11580_v10 }
 0x36a   :  { %10412 = vmatprep.subr.mxu0 %v11580_v10 }
 0x370   :  { %10410 = vmatmul.mubr.f32.vlgmr.msra.gmra.mrb[6].mxu0 %v3501_v49 }
 0x371   :  { %10413 = vmatpush3.xpose.msra.mxu0 %v2594_v40  ;;  %10414 = vmatprep.mubr.msk.f32.mxu0 %vm11581_vm1, %v11580_v10 }
 0x372   :  { %10417 = vmatprep.subr.mxu0 %v11580_v10 }
 0x378   :  { %10415 = vmatmul.mubr.f32.vlgmr.msra.gmra.mrb[6].mxu0 %v3502_v50 }
 0x379   :  { %10418 = vmatpush3.xpose.msra.mxu0 %v11810_v38  ;;  %10419 = vmatprep.mubr.msk.f32.mxu0 %vm11581_vm1, %v11580_v10 }
 0x37a   :  { %10422 = vmatprep.subr.mxu0 %v11580_v10 }
 0x380   :  { %10420 = vmatmul.mubr.f32.vlgmr.msra.gmra.mrb[6].mxu0 %v3503_v51 }
 0x381   :  { %10423 = vmatpush3.xpose.msra.mxu0 %v2595_v42  ;;  %10424 = vmatprep.mubr.msk.f32.mxu0 %vm11581_vm1, %v11580_v10 }
 0x382   :  { %10427 = vmatprep.subr.mxu0 %v11580_v10 }
 0x388   :  { %10425 = vmatmul.mubr.f32.vlgmr.msra.gmra.mrb[6].mxu0 %v3501_v49 }
 0x389   :  { %10428 = vmatpush3.xpose.msra.mxu0 %v11810_v38  ;;  %10429 = vmatprep.mubr.msk.f32.mxu0 %vm11581_vm1, %v11580_v10  ;;  %v7174_v38 = vsub.f32 %v7172_v33, %v7173_v37 }
 0x38a   :  { %10462 = vmatprep.subr.mxu0 %v11580_v10 }
 0x38b   :  { %v7175_v39 = vand.u32 4294901760, %v7174_v38 }
 0x390   :  { %10430 = vmatmul.mubr.f32.vlgmr.msra.gmra.mrb[6].mxu0 %v3501_v49 }
 0x391   :  { %10463 = vmatpush3.xpose.msra.mxu0 %v11867_v58  ;;  %10464 = vmatprep.mubr.msk.f32.mxu0 %vm11581_vm1, %v11580_v10 }
 0x392   :  { %10467 = vmatprep.subr.mxu0 %v11580_v10 }
 0x394   :  { %10465 = vmatmul.mubr.f32.vlgmr.msra.gmra.mrb[8].mxu0 %v4424_v1 }
 0x395   :  { %10468 = vmatpush3.xpose.msra.mxu0 %v4435_v2  ;;  %10469 = vmatprep.mubr.msk.f32.mxu0 %vm11581_vm1, %v11580_v10 }
 0x396   :  { %10472 = vmatprep.subr.mxu0 %v11580_v10 }
 0x39c   :  { %10470 = vmatmul.mubr.f32.vlgmr.msra.gmra.mrb[8].mxu0 %v4420_v57 }
 0x39d   :  { %10473 = vmatpush3.xpose.msra.mxu0 %v4432_v60  ;;  %10474 = vmatprep.mubr.msk.f32.mxu0 %vm11581_vm1, %v11580_v10 }
 0x39e   :  { %10477 = vmatprep.subr.mxu0 %v11580_v10 }
 0x3a4   :  { %10475 = vmatmul.mubr.f32.vlgmr.msra.gmra.mrb[8].mxu0 %v4421_v59 }
 0x3a5   :  { %10478 = vmatpush3.xpose.msra.mxu0 %v11867_v58  ;;  %10479 = vmatprep.mubr.msk.f32.mxu0 %vm11581_vm1, %v11580_v10 }
 0x3a6   :  { %10482 = vmatprep.subr.mxu0 %v11580_v10 }
 0x3ac   :  { %10480 = vmatmul.mubr.f32.vlgmr.msra.gmra.mrb[8].mxu0 %v4422_v61 }
 0x3ad   :  { %10483 = vmatpush3.xpose.msra.mxu0 %v4433_v62  ;;  %10484 = vmatprep.mubr.msk.f32.mxu0 %vm11581_vm1, %v11580_v10 }
 0x3ae   :  { %10487 = vmatprep.subr.mxu0 %v11580_v10 }
 0x3b4   :  { %10485 = vmatmul.mubr.f32.vlgmr.msra.gmra.mrb[8].mxu0 %v4420_v57 }
 0x3b5   :  { %10488 = vmatpush3.xpose.msra.mxu0 %v11867_v58  ;;  %10489 = vmatprep.mubr.msk.f32.mxu0 %vm11581_vm1, %v11580_v10 }
 0x3b6   :  { %10522 = vmatprep.subr.mxu0 %v11580_v10 }
 0x3bc   :  { %10490 = vmatmul.mubr.f32.vlgmr.msra.gmra.mrb[8].mxu0 %v4420_v57 }
 0x3bd   :  { %10523 = vmatpush3.xpose.msra.mxu0 %v11867_v58  ;;  %10524 = vmatprep.mubr.msk.f32.mxu0 %vm11581_vm1, %v11580_v10 }
 0x3be   :  { %10527 = vmatprep.subr.mxu0 %v11580_v10 }
 0x3c0   :  { %10525 = vmatmul.mubr.f32.vlgmr.msra.gmra.mrb[10].mxu0 %v5338_v9 }
 0x3c1   :  { %10528 = vmatpush3.xpose.msra.mxu0 %v4435_v2  ;;  %10529 = vmatprep.mubr.msk.f32.mxu0 %vm11581_vm1, %v11580_v10 }
 0x3c2   :  { %10532 = vmatprep.subr.mxu0 %v11580_v10 }
 0x3c8   :  { %10530 = vmatmul.mubr.f32.vlgmr.msra.gmra.mrb[10].mxu0 %v5334_v5 }
 0x3c9   :  { %10533 = vmatpush3.xpose.msra.mxu0 %v4432_v60  ;;  %10534 = vmatprep.mubr.msk.f32.mxu0 %vm11581_vm1, %v11580_v10 }
 0x3ca   :  { %10537 = vmatprep.subr.mxu0 %v11580_v10 }
 0x3d0   :  { %10535 = vmatmul.mubr.f32.vlgmr.msra.gmra.mrb[10].mxu0 %v5335_v6 }
 0x3d1   :  { %10538 = vmatpush3.xpose.msra.mxu0 %v11867_v58  ;;  %10539 = vmatprep.mubr.msk.f32.mxu0 %vm11581_vm1, %v11580_v10 }
 0x3d2   :  { %10542 = vmatprep.subr.mxu0 %v11580_v10 }
 0x3d8   :  { %10540 = vmatmul.mubr.f32.vlgmr.msra.gmra.mrb[10].mxu0 %v5336_v7 }
 0x3d9   :  { %10543 = vmatpush3.xpose.msra.mxu0 %v4433_v62  ;;  %10544 = vmatprep.mubr.msk.f32.mxu0 %vm11581_vm1, %v11580_v10 }
 0x3da   :  { %10547 = vmatprep.subr.mxu0 %v11580_v10 }
 0x3e0   :  { %10545 = vmatmul.mubr.f32.vlgmr.msra.gmra.mrb[10].mxu0 %v5334_v5 }
 0x3e1   :  { %10548 = vmatpush3.xpose.msra.mxu0 %v11867_v58  ;;  %10549 = vmatprep.mubr.msk.f32.mxu0 %vm11581_vm1, %v11580_v10 }
 0x3e2   :  { %10582 = vmatprep.subr.mxu0 %v11580_v10 }
 0x3e8   :  { %10550 = vmatmul.mubr.f32.vlgmr.msra.gmra.mrb[10].mxu0 %v5334_v5 }
 0x3e9   :  { %10583 = vmatpush3.xpose.msra.mxu0 %v11915_v18  ;;  %10584 = vmatprep.mubr.msk.f32.mxu0 %vm11581_vm1, %v11580_v10 }
 0x3ea   :  { %10587 = vmatprep.subr.mxu0 %v11580_v10 }
 0x3ec   :  { %10585 = vmatmul.mubr.f32.vlgmr.msra.gmra.mrb[12].mxu0 %v6257_v25 }
 0x3ed   :  { %10588 = vmatpush3.xpose.msra.mxu0 %v6268_v26  ;;  %10589 = vmatprep.mubr.msk.f32.mxu0 %vm11581_vm1, %v11580_v10 }
 0x3ee   :  { %10592 = vmatprep.subr.mxu0 %v11580_v10 }
 0x3f4   :  { %10590 = vmatmul.mubr.f32.vlgmr.msra.gmra.mrb[12].mxu0 %v6253_v17 }
 0x3f5   :  { %10593 = vmatpush3.xpose.msra.mxu0 %v6265_v20  ;;  %10594 = vmatprep.mubr.msk.f32.mxu0 %vm11581_vm1, %v11580_v10 }
 0x3f6   :  { %10597 = vmatprep.subr.mxu0 %v11580_v10 }
 0x3fc   :  { %10595 = vmatmul.mubr.f32.vlgmr.msra.gmra.mrb[12].mxu0 %v6254_v19 }
 0x3fd   :  { %10598 = vmatpush3.xpose.msra.mxu0 %v11915_v18  ;;  %10599 = vmatprep.mubr.msk.f32.mxu0 %vm11581_vm1, %v11580_v10 }
 0x3fe   :  { %10602 = vmatprep.subr.mxu0 %v11580_v10 }
 0x404   :  { %10600 = vmatmul.mubr.f32.vlgmr.msra.gmra.mrb[12].mxu0 %v6255_v21 }
 0x405   :  { %10603 = vmatpush3.xpose.msra.mxu0 %v6266_v22  ;;  %10604 = vmatprep.mubr.msk.f32.mxu0 %vm11581_vm1, %v11580_v10 }
 0x406   :  { %10607 = vmatprep.subr.mxu0 %v11580_v10  ;;  %v1124_v30 = vpop.f32.mrb[0].mxu1 }
 0x407   :  { %v10251_v31 = vpop.f32.mrb[1].mxu1  ;;  %v1128_v32 = vsel %vm677_vm2, %v1124_v30, -inf }
 0x408   :  { %1129 = vmax.xlane.f32.xlu0 %v1128_v32 }
 0x40b   :  { %v2038_v34 = vpop.f32.mrb[2].mxu0 }
 0x40c   :  { %v10311_v35 = vpop.f32.mrb[3].mxu0  ;;  %10605 = vmatmul.mubr.f32.vlgmr.msra.gmra.mrb[12].mxu0 %v6253_v17  ;;  %v2042_v36 = vsel %vm677_vm2, %v2038_v34, -inf }
 0x40d   :  { %10608 = vmatpush3.xpose.msra.mxu0 %v11915_v18  ;;  %2043 = vmax.xlane.f32.xlu1 %v2042_v36 }
 0x40e   :  { %10609 = vmatprep.mubr.msk.f32.mxu0 %vm11581_vm1, %v11580_v10  ;;  %10642 = vmatprep.subr.mxu0 %v11580_v10 }
 0x414   :  { %10610 = vmatmul.mubr.f32.vlgmr.msra.gmra.mrb[12].mxu0 %v6253_v17 }
 0x415   :  { %10643 = vmatpush3.xpose.msra.mxu0 %v11915_v18  ;;  %10644 = vmatprep.mubr.msk.f32.mxu0 %vm11581_vm1, %v11580_v10 }
 0x416   :  { %10647 = vmatprep.subr.mxu0 %v11580_v10 }
 0x418   :  { %10645 = vmatmul.mubr.f32.vlgmr.msra.gmra.mrb[14].mxu0 %v7175_v39 }
 0x419   :  { %10648 = vmatpush3.xpose.msra.mxu0 %v6268_v26  ;;  %10649 = vmatprep.mubr.msk.f32.mxu0 %vm11581_vm1, %v11580_v10 }
 0x41a   :  { %10652 = vmatprep.subr.mxu0 %v11580_v10 }
 0x420   :  { %10650 = vmatmul.mubr.f32.vlgmr.msra.gmra.mrb[14].mxu0 %v7171_v29 }
 0x421   :  { %10653 = vmatpush3.xpose.msra.mxu0 %v6265_v20  ;;  %10654 = vmatprep.mubr.msk.f32.mxu0 %vm11581_vm1, %v11580_v10 }
 0x422   :  { %10657 = vmatprep.subr.mxu0 %v11580_v10 }
 0x428   :  { %10655 = vmatmul.mubr.f32.vlgmr.msra.gmra.mrb[14].mxu0 %v7172_v33 }
 0x429   :  { %10658 = vmatpush3.xpose.msra.mxu0 %v11915_v18  ;;  %10659 = vmatprep.mubr.msk.f32.mxu0 %vm11581_vm1, %v11580_v10 }
 0x42a   :  { %10662 = vmatprep.subr.mxu0 %v11580_v10 }
 0x430   :  { %10660 = vmatmul.mubr.f32.vlgmr.msra.gmra.mrb[14].mxu0 %v7173_v37 }
 0x431   :  { %10663 = vmatpush3.xpose.msra.mxu0 %v6266_v22  ;;  %10664 = vmatprep.mubr.msk.f32.mxu0 %vm11581_vm1, %v11580_v10 }
 0x432   :  { %10667 = vmatprep.subr.mxu0 %v11580_v10 }
 0x437   :  { %v2958_v40 = vpop.f32.mrb[4].mxu0 }
 0x438   :  { %v10371_v41 = vpop.f32.mrb[5].mxu0  ;;  %10665 = vmatmul.mubr.f32.vlgmr.msra.gmra.mrb[14].mxu0 %v7171_v29  ;;  %v2962_v55 = vsel %vm677_vm2, %v2958_v40, -inf }
 0x439   :  { %10668 = vmatpush3.xpose.msra.mxu0 %v11915_v18  ;;  %10669 = vmatprep.mubr.msk.f32.mxu0 %vm11581_vm1, %v11580_v10 }
 0x440   :  { %10670 = vmatmul.mubr.f32.vlgmr.msra.gmra.mrb[14].mxu0 %v7171_v29 }
 0x463   :  { %v3877_v42 = vpop.f32.mrb[6].mxu0 }
 0x464   :  { %v10431_v43 = vpop.f32.mrb[7].mxu0  ;;  %v3881_v57 = vsel %vm677_vm2, %v3877_v42, -inf }
 0x48f   :  { %v4796_v44 = vpop.f32.mrb[8].mxu0 }
 0x490   :  { %v10491_v45 = vpop.f32.mrb[9].mxu0  ;;  %v4800_v58 = vsel %vm677_vm2, %v4796_v44, -inf }
 0x495   :  { %v1130_v46 = vpop.xlane.xlu0 %1129 }
 0x496   :  { %v1131_v47 = vsub.f32 %v1124_v30, %v1130_v46 }
 0x498   :  { %v1132_v48 = vmul.f32 1.442695, %v1131_v47 }
 0x49a   :  { %v2044_v49 = vpop.xlane.xlu1 %2043  ;;  %11414 = vpow2.f32 %v1132_v48 }
 0x49b   :  { %v2045_v50 = vsub.f32 %v2038_v34, %v2044_v49 }
 0x49d   :  { %v2046_v51 = vmul.f32 1.442695, %v2045_v50 }
 0x49f   :  { %11416 = vpow2.f32 %v2046_v51 }
 0x4a4   :  { %v11415_v52 = vpop.eup %11414 }
 0x4a5   :  { %v1134_v53 = vsel %vm677_vm2, %v11415_v52, 0.0 }
 0x4a6   :  { %1135 = vadd.xlane.f32.xlu0 %v1134_v53 }
 0x4a9   :  { %v11967_v54 = vpop.eup %11416 }
 0x4aa   :  { %v2048_v56 = vsel %vm677_vm2, %v11967_v54, 0.0  ;;  %2963 = vmax.xlane.f32.xlu0 %v2962_v55 }
 0x4ab   :  { %2049 = vadd.xlane.f32.xlu1 %v2048_v56 }
 0x4af   :  { %3882 = vmax.xlane.f32.xlu1 %v3881_v57 }
 0x4b3   :  { %4801 = vmax.xlane.f32.xlu1 %v4800_v58 }
 0x4bb   :  { %v11974_v59 = vpop.f32.mrb[10].mxu0 }
 0x4bc   :  { %v10551_v60 = vpop.f32.mrb[11].mxu0  ;;  %v5714_v43 = vsel %vm677_vm2, %v11974_v59, -inf }
 0x4c0   :  { %1139 = vrot.lane.b32.xlu0 %v11758_v12, %s11587_s25 }
 0x4e7   :  { %v11978_v61 = vpop.f32.mrb[12].mxu0 }
 0x4e8   :  { %v10611_v62 = vpop.f32.mrb[13].mxu0  ;;  %v6633_v35 = vsel %vm677_vm2, %v11978_v61, -inf }
 0x513   :  { %v11980_v63 = vpop.f32.mrb[14].mxu0 }
 0x514   :  { %v10671_v0 = vpop.f32.mrb[15].mxu0 }
 0x533   :  { %v1136_v1 = vpop.xlane.xlu0 %1135 }
 0x534   :  { %11418 = vrcp.f32 %v1136_v1 }
 0x537   :  { %v2964_v2 = vpop.xlane.xlu0 %2963 }
 0x538   :  { %v2050_v3 = vpop.xlane.xlu1 %2049  ;;  %v2965_v4 = vsub.f32 %v2958_v40, %v2964_v2 }
 0x53a   :  { %v2966_v5 = vmul.f32 1.442695, %v2965_v4 }
 0x53b   :  { %v1140_v6 = vpop.permute.xlu0 %1139 }
 0x53c   :  { %v3883_v7 = vpop.xlane.xlu1 %3882  ;;  %11420 = vpow2.f32 %v2966_v5  ;;  %v11982_v8 = vand.u32 4294901760, %v1140_v6 }
 0x53d   :  { %v3884_v9 = vsub.f32 %v3877_v42, %v3883_v7 }
 0x53e   :  { %v11419_v13 = vpop.eup %11418  ;;  %10253 = vmatpush3.msra.mxu1 %v11982_v8  ;;  %v11986_v16 = vsub.f32 %v1140_v6, %v11982_v8 }
 0x53f   :  { %v3885_v14 = vmul.f32 1.442695, %v3884_v9  ;;  %v1138_v15 = vmul.f32 %v11419_v13, %v11415_v52  ;;  %10257 = vmatprep.subr.mxu1 %v11580_v10 }
 0x540   :  { %v4802_v17 = vpop.xlane.xlu1 %4801  ;;  %v11991_v22 = vand.u32 4294901760, %v11986_v16 }
 0x541   :  { %11422 = vpow2.f32 %v3885_v14  ;;  %v4803_v18 = vsub.f32 %v4796_v44, %v4802_v17  ;;  %v1143_v19 = vsel %vm677_vm2, %v1138_v15, 0  ;;  %v7551_v17 = vsel %vm677_vm2, %v11980_v63, -inf }
 0x542   :  { %v1211_v21 = vand.u32 4294901760, %v1143_v19  ;;  %v1225_v27 = vsub.f32 %v11986_v16, %v11991_v22 }
 0x543   :  { %v4804_v20 = vmul.f32 1.442695, %v4803_v18 }
 0x544   :  { %v1212_v23 = vsub.f32 %v1143_v19, %v1211_v21  ;;  %v1226_v31 = vand.u32 4294901760, %v1225_v27 }
 0x545   :  { %11424 = vpow2.f32 %v4804_v20 }
 0x546   :  { %v11993_v24 = vpop.eup %11420  ;;  %v1213_v25 = vand.u32 4294901760, %v1212_v23  ;;  %11426 = vrcp.f32 %v2050_v3 }
 0x547   :  { %v2968_v26 = vsel %vm677_vm2, %v11993_v24, 0.0 }
 0x548   :  { %2969 = vadd.xlane.f32.xlu1 %v2968_v26  ;;  %v1214_v28 = vsub.f32 %v1212_v23, %v1213_v25 }
 0x54a   :  { %v1215_v30 = vand.u32 4294901760, %v1214_v28 }
 0x54b   :  { %v11999_v29 = vpop.eup %11422 }
 0x54c   :  { %v3887_v32 = vsel %vm677_vm2, %v11999_v29, 0.0  ;;  %10255 = vmatmul.mubr.f32.vlgmr.msra.gmra.mrb[2].mxu1 %v1215_v30 }
 0x54d   :  { %3888 = vadd.xlane.f32.xlu0 %v3887_v32  ;;  %10258 = vmatpush3.msra.mxu1 %v1226_v31 }
 0x54e   :  { %10259 = vmatprep.mubr.msk.f32.mxu1 %vm11581_vm1, %v11580_v10  ;;  %10262 = vmatprep.subr.mxu1 %v11580_v10 }
 0x54f   :  { %v12005_v33 = vpop.eup %11424 }
 0x550   :  { %v4806_v34 = vsel %vm677_vm2, %v12005_v33, 0.0  ;;  %v11427_v36 = vpop.eup %11426 }
 0x551   :  { %4807 = vadd.xlane.f32.xlu0 %v4806_v34  ;;  %v2052_v37 = vmul.f32 %v11427_v36, %v11967_v54 }
 0x553   :  { %v2054_v38 = vsel %vm677_vm2, %v2052_v37, 0 }
 0x554   :  { %10260 = vmatmul.mubr.f32.vlgmr.msra.gmra.mrb[2].mxu1 %v1211_v21 }
 0x555   :  { %6634 = vmax.xlane.f32.xlu0 %v6633_v35  ;;  %10263 = vmatpush3.msra.mxu1 %v11986_v16 }
 0x556   :  { %10264 = vmatprep.mubr.msk.f32.mxu1 %vm11581_vm1, %v11580_v10  ;;  %10267 = vmatprep.subr.mxu1 %v11580_v10 }
 0x559   :  { %2973 = vrot.lane.b32.xlu1 %v11758_v12, %s11588_s27  ;;  %v2122_v12 = vand.u32 4294901760, %v2054_v38 }
 0x55b   :  { %v2123_v39 = vsub.f32 %v2054_v38, %v2122_v12 }
 0x55c   :  { %10265 = vmatmul.mubr.f32.vlgmr.msra.gmra.mrb[2].mxu1 %v1212_v23 }
 0x55d   :  { %10268 = vmatpush3.msra.mxu1 %v11982_v8  ;;  %10269 = vmatprep.mubr.msk.f32.mxu1 %vm11581_vm1, %v11580_v10  ;;  %v2124_v40 = vand.u32 4294901760, %v2123_v39 }
 0x55e   :  { %10272 = vmatprep.subr.mxu1 %v11580_v10 }
 0x55f   :  { %v2125_v41 = vsub.f32 %v2123_v39, %v2124_v40 }
 0x561   :  { %v2126_v42 = vand.u32 4294901760, %v2125_v41 }
 0x564   :  { %10270 = vmatmul.mubr.f32.vlgmr.msra.gmra.mrb[2].mxu1 %v1213_v25 }
 0x565   :  { %10273 = vmatpush3.msra.mxu1 %v11991_v22  ;;  %10274 = vmatprep.mubr.msk.f32.mxu1 %vm11581_vm1, %v11580_v10 }
 0x566   :  { %10277 = vmatprep.subr.mxu1 %v11580_v10 }
 0x56b   :  { %4811 = vrot.lane.b32.xlu0 %v11756_v11, %s11587_s25 }
 0x56c   :  { %10275 = vmatmul.mubr.f32.vlgmr.msra.gmra.mrb[2].mxu1 %v1211_v21 }
 0x56d   :  { %10278 = vmatpush3.msra.mxu1 %v11982_v8  ;;  %10279 = vmatprep.mubr.msk.f32.mxu1 %vm11581_vm1, %v11580_v10 }
 0x56e   :  { %10312 = vmatprep.subr.mxu1 %v11580_v10 }
 0x574   :  { %10280 = vmatmul.mubr.f32.vlgmr.msra.gmra.mrb[2].mxu1 %v1211_v21 }
 0x575   :  { %10313 = vmatpush3.msra.mxu1 %v11982_v8  ;;  %10314 = vmatprep.mubr.msk.f32.mxu1 %vm11581_vm1, %v11580_v10 }
 0x576   :  { %10317 = vmatprep.subr.mxu1 %v11580_v10 }
 0x578   :  { %10315 = vmatmul.mubr.f32.vlgmr.msra.gmra.mrb[4].mxu1 %v2126_v42 }
 0x579   :  { %10318 = vmatpush3.msra.mxu1 %v1226_v31  ;;  %10319 = vmatprep.mubr.msk.f32.mxu1 %vm11581_vm1, %v11580_v10 }
 0x57a   :  { %10322 = vmatprep.subr.mxu1 %v11580_v10 }
 0x57d   :  { %5715 = vmax.xlane.f32.xlu1 %v5714_v43 }
 0x580   :  { %10320 = vmatmul.mubr.f32.vlgmr.msra.gmra.mrb[4].mxu1 %v2122_v12 }
 0x581   :  { %10323 = vmatpush3.msra.mxu1 %v11986_v16  ;;  %10324 = vmatprep.mubr.msk.f32.mxu1 %vm11581_vm1, %v11580_v10 }
 0x582   :  { %10327 = vmatprep.subr.mxu1 %v11580_v10 }
 0x588   :  { %10325 = vmatmul.mubr.f32.vlgmr.msra.gmra.mrb[4].mxu1 %v2123_v39 }
 0x589   :  { %10328 = vmatpush3.msra.mxu1 %v11982_v8  ;;  %10329 = vmatprep.mubr.msk.f32.mxu1 %vm11581_vm1, %v11580_v10 }
 0x58a   :  { %10332 = vmatprep.subr.mxu1 %v11580_v10 }
 0x590   :  { %10330 = vmatmul.mubr.f32.vlgmr.msra.gmra.mrb[4].mxu1 %v2124_v40 }
 0x591   :  { %10333 = vmatpush3.msra.mxu1 %v11991_v22  ;;  %10334 = vmatprep.mubr.msk.f32.mxu1 %vm11581_vm1, %v11580_v10 }
 0x592   :  { %10337 = vmatprep.subr.mxu1 %v11580_v10 }
 0x598   :  { %10335 = vmatmul.mubr.f32.vlgmr.msra.gmra.mrb[4].mxu1 %v2122_v12 }
 0x599   :  { %10338 = vmatpush3.msra.mxu1 %v11982_v8  ;;  %10339 = vmatprep.mubr.msk.f32.mxu1 %vm11581_vm1, %v11580_v10 }
 0x59a   :  { %10372 = vmatprep.subr.mxu1 %v11580_v10 }
 0x5a0   :  { %10340 = vmatmul.mubr.f32.vlgmr.msra.gmra.mrb[4].mxu1 %v2122_v12 }
 0x5a1   :  { %10374 = vmatprep.mubr.msk.f32.mxu1 %vm11581_vm1, %v11580_v10 }
 0x5d5   :  { %v2970_v44 = vpop.xlane.xlu1 %2969 }
 0x5d6   :  { %11428 = vrcp.f32 %v2970_v44 }
 0x5d9   :  { %v2974_v45 = vpop.permute.xlu1 %2973 }
 0x5da   :  { %v12061_v46 = vand.u32 4294901760, %v2974_v45  ;;  %v3889_v60 = vpop.xlane.xlu0 %3888 }
 0x5db   :  { %11430 = vrcp.f32 %v3889_v60 }
 0x5dc   :  { %10373 = vmatpush3.msra.mxu1 %v12061_v46  ;;  %v12067_v49 = vsub.f32 %v2974_v45, %v12061_v46 }
 0x5dd   :  { %10377 = vmatprep.subr.mxu1 %v11580_v10 }
 0x5de   :  { %v12071_v52 = vand.u32 4294901760, %v12067_v49  ;;  %v4808_v1 = vpop.xlane.xlu0 %4807 }
 0x5e0   :  { %v11429_v47 = vpop.eup %11428  ;;  %v3059_v55 = vsub.f32 %v12067_v49, %v12071_v52 }
 0x5e1   :  { %v2972_v48 = vmul.f32 %v11429_v47, %v11993_v24 }
 0x5e2   :  { %v3060_v58 = vand.u32 4294901760, %v3059_v55  ;;  %v6635_v4 = vpop.xlane.xlu0 %6634 }
 0x5e3   :  { %v2977_v50 = vsel %vm677_vm2, %v2972_v48, 0  ;;  %v6636_v8 = vsub.f32 %v11978_v61, %v6635_v4 }
 0x5e4   :  { %v3045_v51 = vand.u32 4294901760, %v2977_v50 }
 0x5e5   :  { %v11431_v62 = vpop.eup %11430  ;;  %v6637_v14 = vmul.f32 1.442695, %v6636_v8 }
 0x5e6   :  { %v3046_v53 = vsub.f32 %v2977_v50, %v3045_v51  ;;  %v3891_v0 = vmul.f32 %v11431_v62, %v11999_v29  ;;  %v4812_v23 = vpop.permute.xlu0 %4811 }
 0x5e7   :  { %v12135_v25 = vand.u32 4294901760, %v4812_v23 }
 0x5e8   :  { %v3047_v54 = vand.u32 4294901760, %v3046_v53  ;;  %v3893_v2 = vsel %vm677_vm2, %v3891_v0, 0 }
 0x5e9   :  { %v12092_v3 = vand.u32 4294901760, %v3893_v2  ;;  %v12138_v27 = vsub.f32 %v4812_v23, %v12135_v25 }
 0x5ea   :  { %v3048_v56 = vsub.f32 %v3046_v53, %v3047_v54 }
 0x5eb   :  { %v3962_v7 = vsub.f32 %v3893_v2, %v12092_v3 }
 0x5ec   :  { %v3049_v57 = vand.u32 4294901760, %v3048_v56 }
 0x5ed   :  { %v3963_v13 = vand.u32 4294901760, %v3962_v7 }
 0x5ee   :  { %10375 = vmatmul.mubr.f32.vlgmr.msra.gmra.mrb[6].mxu1 %v3049_v57 }
 0x5ef   :  { %10378 = vmatpush3.msra.mxu1 %v3060_v58  ;;  %10379 = vmatprep.mubr.msk.f32.mxu1 %vm11581_vm1, %v11580_v10  ;;  %v3964_v15 = vsub.f32 %v3962_v7, %v3963_v13 }
 0x5f0   :  { %10382 = vmatprep.subr.mxu1 %v11580_v10 }
 0x5f6   :  { %10380 = vmatmul.mubr.f32.vlgmr.msra.gmra.mrb[6].mxu1 %v3045_v51 }
 0x5f7   :  { %10383 = vmatpush3.msra.mxu1 %v12067_v49  ;;  %10384 = vmatprep.mubr.msk.f32.mxu1 %vm11581_vm1, %v11580_v10 }
 0x5f8   :  { %10387 = vmatprep.subr.mxu1 %v11580_v10 }
 0x5fe   :  { %10385 = vmatmul.mubr.f32.vlgmr.msra.gmra.mrb[6].mxu1 %v3046_v53 }
 0x5ff   :  { %10388 = vmatpush3.msra.mxu1 %v12061_v46  ;;  %10389 = vmatprep.mubr.msk.f32.mxu1 %vm11581_vm1, %v11580_v10 }
 0x600   :  { %10392 = vmatprep.subr.mxu1 %v11580_v10 }
 0x606   :  { %10390 = vmatmul.mubr.f32.vlgmr.msra.gmra.mrb[6].mxu1 %v3047_v54 }
 0x607   :  { %10393 = vmatpush3.msra.mxu1 %v12071_v52  ;;  %10394 = vmatprep.mubr.msk.f32.mxu1 %vm11581_vm1, %v11580_v10 }
 0x608   :  { %10397 = vmatprep.subr.mxu1 %v11580_v10 }
 0x60a   :  { %v5716_v5 = vpop.xlane.xlu1 %5715 }
 0x60b   :  { %v5717_v6 = vsub.f32 %v11974_v59, %v5716_v5  ;;  %v3965_v59 = vand.u32 4294901760, %v3964_v15 }
 0x60d   :  { %v5718_v9 = vmul.f32 1.442695, %v5717_v6 }
 0x60e   :  { %10395 = vmatmul.mubr.f32.vlgmr.msra.gmra.mrb[6].mxu1 %v3045_v51 }
 0x60f   :  { %11432 = vpow2.f32 %v5718_v9  ;;  %10398 = vmatpush3.msra.mxu1 %v12061_v46  ;;  %10399 = vmatprep.mubr.msk.f32.mxu1 %vm11581_vm1, %v11580_v10 }
 0x610   :  { %10432 = vmatprep.subr.mxu1 %v11580_v10  ;;  %11434 = vpow2.f32 %v6637_v14 }
 0x611   :  { %11436 = vrcp.f32 %v4808_v1 }
 0x616   :  { %10400 = vmatmul.mubr.f32.vlgmr.msra.gmra.mrb[6].mxu1 %v3045_v51 }
 0x617   :  { %10433 = vmatpush3.msra.mxu1 %v12061_v46  ;;  %10434 = vmatprep.mubr.msk.f32.mxu1 %vm11581_vm1, %v11580_v10 }
 0x618   :  { %10437 = vmatprep.subr.mxu1 %v11580_v10 }
 0x619   :  { %v12105_v61 = vpop.eup %11432 }
 0x61a   :  { %10435 = vmatmul.mubr.f32.vlgmr.msra.gmra.mrb[8].mxu1 %v3965_v59  ;;  %v5720_v16 = vsel %vm677_vm2, %v12105_v61, 0.0  ;;  %v12114_v18 = vpop.eup %11434 }
 0x61b   :  { %10438 = vmatpush3.msra.mxu1 %v3060_v58  ;;  %5721 = vadd.xlane.f32.xlu1 %v5720_v16  ;;  %v6639_v19 = vsel %vm677_vm2, %v12114_v18, 0.0  ;;  %v11437_v20 = vpop.eup %11436 }
 0x61c   :  { %10439 = vmatprep.mubr.msk.f32.mxu1 %vm11581_vm1, %v11580_v10  ;;  %10442 = vmatprep.subr.mxu1 %v11580_v10  ;;  %v4810_v21 = vmul.f32 %v11437_v20, %v12005_v33 }
 0x61e   :  { %v4815_v22 = vsel %vm677_vm2, %v4810_v21, 0 }
 0x61f   :  { %7552 = vmax.xlane.f32.xlu1 %v7551_v17  ;;  %v4883_v24 = vand.u32 4294901760, %v4815_v22 }
 0x621   :  { %v4884_v26 = vsub.f32 %v4815_v22, %v4883_v24 }
 0x622   :  { %10440 = vmatmul.mubr.f32.vlgmr.msra.gmra.mrb[8].mxu1 %v12092_v3 }
 0x623   :  { %10443 = vmatpush3.msra.mxu1 %v12067_v49  ;;  %6640 = vadd.xlane.f32.xlu1 %v6639_v19  ;;  %v4885_v28 = vand.u32 4294901760, %v4884_v26 }
 0x624   :  { %10444 = vmatprep.mubr.msk.f32.mxu1 %vm11581_vm1, %v11580_v10  ;;  %10447 = vmatprep.subr.mxu1 %v11580_v10 }
 0x625   :  { %v4886_v29 = vsub.f32 %v4884_v26, %v4885_v28 }
 0x627   :  { %v4887_v31 = vand.u32 4294901760, %v4886_v29 }
 0x62a   :  { %10445 = vmatmul.mubr.f32.vlgmr.msra.gmra.mrb[8].mxu1 %v3962_v7 }
 0x62b   :  { %10448 = vmatpush3.msra.mxu1 %v12061_v46  ;;  %10449 = vmatprep.mubr.msk.f32.mxu1 %vm11581_vm1, %v11580_v10 }
 0x62c   :  { %10452 = vmatprep.subr.mxu1 %v11580_v10 }
 0x632   :  { %10450 = vmatmul.mubr.f32.vlgmr.msra.gmra.mrb[8].mxu1 %v3963_v13 }
 0x633   :  { %10453 = vmatpush3.msra.mxu1 %v12071_v52  ;;  %10454 = vmatprep.mubr.msk.f32.mxu1 %vm11581_vm1, %v11580_v10 }
 0x634   :  { %6644 = vrot.lane.b32.xlu1 %v11756_v11, %s11588_s27  ;;  %10457 = vmatprep.subr.mxu1 %v11580_v10  ;;  %v12146_v11 = vand.u32 4294901760, %v12138_v27 }
 0x636   :  { %v4897_v30 = vsub.f32 %v12138_v27, %v12146_v11 }
 0x638   :  { %v4898_v32 = vand.u32 4294901760, %v4897_v30 }
 0x63a   :  { %10455 = vmatmul.mubr.f32.vlgmr.msra.gmra.mrb[8].mxu1 %v12092_v3 }
 0x63b   :  { %10458 = vmatpush3.msra.mxu1 %v12061_v46  ;;  %10459 = vmatprep.mubr.msk.f32.mxu1 %vm11581_vm1, %v11580_v10 }
 0x63c   :  { %10492 = vmatprep.subr.mxu1 %v11580_v10 }
 0x642   :  { %10460 = vmatmul.mubr.f32.vlgmr.msra.gmra.mrb[8].mxu1 %v12092_v3 }
 0x643   :  { %10493 = vmatpush3.msra.mxu1 %v12135_v25  ;;  %10494 = vmatprep.mubr.msk.f32.mxu1 %vm11581_vm1, %v11580_v10 }
 0x644   :  { %10497 = vmatprep.subr.mxu1 %v11580_v10 }
 0x646   :  { %10495 = vmatmul.mubr.f32.vlgmr.msra.gmra.mrb[10].mxu1 %v4887_v31 }
 0x647   :  { %10498 = vmatpush3.msra.mxu1 %v4898_v32  ;;  %v1587_v33 = vpop.f32.mrb[2].mxu1  ;;  %10499 = vmatprep.mubr.msk.f32.mxu1 %vm11581_vm1, %v11580_v10 }
 0x648   :  { %1591 = vst.msk [vmem:[#allocation2] sm:$0xff] %vm677_vm2, %v1587_v33  ;;  %v10281_v34 = vpop.f32.mrb[3].mxu1  ;;  %10502 = vmatprep.subr.mxu1 %v11580_v10  ;;  %v8019_v33 = vld [vmem:[%s12494_s4 + $0x8] sm:$0xff] }
 0x649   :  { %v8020_v34 = vld [vmem:[%s12494_s4 + $0x10] sm:$0xff] }
 0x64e   :  { %10500 = vmatmul.mubr.f32.vlgmr.msra.gmra.mrb[10].mxu1 %v4883_v24 }
 0x64f   :  { %10503 = vmatpush3.msra.mxu1 %v12138_v27  ;;  %10504 = vmatprep.mubr.msk.f32.mxu1 %vm11581_vm1, %v11580_v10 }
 0x650   :  { %10507 = vmatprep.subr.mxu1 %v11580_v10 }
 0x656   :  { %10505 = vmatmul.mubr.f32.vlgmr.msra.gmra.mrb[10].mxu1 %v4884_v26 }
 0x657   :  { %10508 = vmatpush3.msra.mxu1 %v12135_v25  ;;  %10509 = vmatprep.mubr.msk.f32.mxu1 %vm11581_vm1, %v11580_v10 }
 0x658   :  { %10512 = vmatprep.subr.mxu1 %v11580_v10 }
 0x65e   :  { %10510 = vmatmul.mubr.f32.vlgmr.msra.gmra.mrb[10].mxu1 %v4885_v28 }
 0x65f   :  { %10513 = vmatpush3.msra.mxu1 %v12146_v11  ;;  %10514 = vmatprep.mubr.msk.f32.mxu1 %vm11581_vm1, %v11580_v10 }
 0x660   :  { %10517 = vmatprep.subr.mxu1 %v11580_v10 }
 0x666   :  { %10515 = vmatmul.mubr.f32.vlgmr.msra.gmra.mrb[10].mxu1 %v4883_v24 }
 0x667   :  { %10518 = vmatpush3.msra.mxu1 %v12135_v25  ;;  %10519 = vmatprep.mubr.msk.f32.mxu1 %vm11581_vm1, %v11580_v10 }
 0x668   :  { %10552 = vmatprep.subr.mxu1 %v11580_v10 }
 0x66e   :  { %10520 = vmatmul.mubr.f32.vlgmr.msra.gmra.mrb[10].mxu1 %v4883_v24 }
 0x66f   :  { %10553 = vmatpush3.msra.mxu1 %v12135_v25  ;;  %10554 = vmatprep.mubr.msk.f32.mxu1 %vm11581_vm1, %v11580_v10 }
 0x670   :  { %10557 = vmatprep.subr.mxu1 %v11580_v10 }
 0x673   :  { %v2498_v35 = vpop.f32.mrb[4].mxu1 }
 0x674   :  { %2503 = vrot.lane.b32.xlu1 %v2498_v35, %s11577_s18  ;;  %v10341_v36 = vpop.f32.mrb[5].mxu1 }
 0x675   :  { %v8032_v36 = vand.u32 4294901760, %v8019_v33 }
 0x6a8   :  { %v5722_v37 = vpop.xlane.xlu1 %5721 }
 0x6a9   :  { %11438 = vrcp.f32 %v5722_v37  ;;  %v8021_v37 = vld [vmem:[%s12494_s4 + $0x18] sm:$0xff] }
 0x6ac   :  { %v7553_v38 = vpop.xlane.xlu1 %7552 }
 0x6ad   :  { %v7554_v12 = vsub.f32 %v11980_v63, %v7553_v38  ;;  %v8035_v38 = vand.u32 4294901760, %v8020_v34 }
 0x6af   :  { %v7555_v39 = vmul.f32 1.442695, %v7554_v12  ;;  %v8038_v12 = vand.u32 4294901760, %v8021_v37 }
 0x6b0   :  { %v6641_v63 = vpop.xlane.xlu1 %6640 }
 0x6b1   :  { %11440 = vpow2.f32 %v7555_v39 }
 0x6b2   :  { %11442 = vrcp.f32 %v6641_v63  ;;  %v8133_v63 = vsub.f32 %v8020_v34, %v8035_v38  ;;  %v8605_v34 = vld [vmem:[%s12497_s7 + $0x18] sm:$0xff] }
 0x6b3   :  { %v11439_v40 = vpop.eup %11438 }
 0x6b4   :  { %v5724_v41 = vmul.f32 %v11439_v40, %v12105_v61  ;;  %v6645_v53 = vpop.permute.xlu1 %6644  ;;  %v12298_v40 = vpack.c.bf16 %v8038_v12, %v8035_v38 }
 0x6b5   :  { %v12204_v55 = vand.u32 4294901760, %v6645_v53 }
 0x6b6   :  { %v5726_v42 = vsel %vm677_vm2, %v5724_v41, 0 }
 0x6b7   :  { %v5794_v43 = vand.u32 4294901760, %v5726_v42  ;;  %v12207_v57 = vsub.f32 %v6645_v53, %v12204_v55  ;;  %v8134_v53 = vand.u32 4294901760, %v8133_v63 }
 0x6b9   :  { %v5795_v44 = vsub.f32 %v5726_v42, %v5794_v43  ;;  %v12214_v60 = vand.u32 4294901760, %v12207_v57 }
 0x6bb   :  { %v12183_v45 = vpop.eup %11440  ;;  %v5796_v46 = vand.u32 4294901760, %v5795_v44  ;;  %v6730_v1 = vsub.f32 %v12207_v57, %v12214_v60 }
 0x6bc   :  { %v7557_v47 = vsel %vm677_vm2, %v12183_v45, 0.0  ;;  %v11443_v50 = vpop.eup %11442 }
 0x6bd   :  { %7558 = vadd.xlane.f32.xlu0 %v7557_v47  ;;  %v5797_v48 = vsub.f32 %v5795_v44, %v5796_v46  ;;  %v6643_v51 = vmul.f32 %v11443_v50, %v12114_v18  ;;  %v6731_v5 = vand.u32 4294901760, %v6730_v1  ;;  %v8140_v50 = vsub.f32 %v8021_v37, %v8038_v12 }
 0x6bf   :  { %v5798_v49 = vand.u32 4294901760, %v5797_v48  ;;  %v6648_v52 = vsel %vm677_vm2, %v6643_v51, 0  ;;  %v11016_v1 = vpack.c.bf16 %v8140_v50, %v8133_v63 }
 0x6c0   :  { %v6716_v54 = vand.u32 4294901760, %v6648_v52 }
 0x6c1   :  { %10555 = vmatmul.mubr.f32.vlgmr.msra.gmra.mrb[12].mxu1 %v5798_v49 }
 0x6c2   :  { %10558 = vmatpush3.msra.mxu1 %v4898_v32  ;;  %10559 = vmatprep.mubr.msk.f32.mxu1 %vm11581_vm1, %v11580_v10  ;;  %v6717_v56 = vsub.f32 %v6648_v52, %v6716_v54  ;;  %v8018_v32 = vld [vmem:[%s12494_s4] sm:$0xff]  ;;  %s9776_s4 = sshll.u32 %s11591_s15, 4  ;;  %s9777_s4 = int_to_ptr.vmem [resolvable:$true] %s9776_s4 }
 0x6c3   :  { %10562 = vmatprep.subr.mxu1 %v11580_v10  ;;  %v8029_v35 = vand.u32 4294901760, %v8018_v32  ;;  %s11544_s16 = scalar_lea.vmem %s9777_s4, 256  ;;  %p11549_p5 = scmp.lt.s32.totalorder %s9777_s4, %s9777_s4 }
 0x6c4   :  { %v6718_v58 = vand.u32 4294901760, %v6717_v56  ;;  %p11545_p4 = scmp.ne.s32.totalorder %s9777_s4, %s11544_s16  ;;  %p11550_p6 = scmp.lt.s32.totalorder %s11544_s16, %s11544_s16 }
 0x6c5   :  { %v12296_v39 = vpack.c.bf16 %v8032_v36, %v8029_v35  ;;  %v8119_v42 = vsub.f32 %v8018_v32, %v8029_v35 }
 0x6c6   :  { %v6719_v0 = vsub.f32 %v6717_v56, %v6718_v58  ;;  %p11551_p7 = por %p11550_p6, %p11549_p5 }
 0x6c7   :  { %10997 = vmatprep.subr.bf16.mxu0 %v12296_v39 }
 0x6c8   :  { %v6720_v4 = vand.u32 4294901760, %v6719_v0  ;;  %10999 = vmatpush3.bf16.msra.mxu0 %v12296_v39  ;;  %p11552_p8 = pnand %p11551_p7, %p11545_p4 }
 0x6c9   :  { %10560 = vmatmul.mubr.f32.vlgmr.msra.gmra.mrb[12].mxu1 %v5794_v43  ;;  %11001 = vmatprep.subr.bf16.mxu0 %v12298_v40 }
 0x6ca   :  { %10563 = vmatpush3.msra.mxu1 %v12138_v27  ;;  %10564 = vmatprep.mubr.msk.f32.mxu1 %vm11581_vm1, %v11580_v10 }
 0x6cb   :  { %10567 = vmatprep.subr.mxu1 %v11580_v10 }
 0x6cc   :  { %11003 = vmatpush3.bf16.msra.mxu0 %v12298_v40 }
 0x6d1   :  { %10565 = vmatmul.mubr.f32.vlgmr.msra.gmra.mrb[12].mxu1 %v5795_v44 }
 0x6d2   :  { %10568 = vmatpush3.msra.mxu1 %v12135_v25  ;;  %10569 = vmatprep.mubr.msk.f32.mxu1 %vm11581_vm1, %v11580_v10 }
 0x6d3   :  { %10572 = vmatprep.subr.mxu1 %v11580_v10 }
 0x6d9   :  { %10570 = vmatmul.mubr.f32.vlgmr.msra.gmra.mrb[12].mxu1 %v5796_v46 }
 0x6da   :  { %10573 = vmatpush3.msra.mxu1 %v12146_v11  ;;  %10574 = vmatprep.mubr.msk.f32.mxu1 %vm11581_vm1, %v11580_v10 }
 0x6db   :  { %10577 = vmatprep.subr.mxu1 %v11580_v10 }
 0x6e1   :  { %10575 = vmatmul.mubr.f32.vlgmr.msra.gmra.mrb[12].mxu1 %v5794_v43 }
 0x6e2   :  { %10578 = vmatpush3.msra.mxu1 %v12135_v25  ;;  %10579 = vmatprep.mubr.msk.f32.mxu1 %vm11581_vm1, %v11580_v10 }
 0x6e3   :  { %10612 = vmatprep.subr.mxu1 %v11580_v10 }
 0x6e6   :  { %v2504_v62 = vpop.permute.xlu1 %2503 }
 0x6e7   :  { %2507 = vst.msk [vmem:[#allocation2] sm:$0xff] %vm2506_vm3, %v2504_v62 }
 0x6e9   :  { %v3421_v2 = vpop.f32.mrb[6].mxu1  ;;  %10580 = vmatmul.mubr.f32.vlgmr.msra.gmra.mrb[12].mxu1 %v5794_v43  ;;  %v8126_v43 = vsub.f32 %v8019_v33, %v8032_v36  ;;  %v8629_v36 = vand.u32 4294901760, %v8605_v34 }
 0x6ea   :  { %10613 = vmatpush3.msra.mxu1 %v12204_v55  ;;  %3426 = vrot.lane.b32.xlu1 %v3421_v2, %s11589_s29  ;;  %v10401_v3 = vpop.f32.mrb[7].mxu1 }
 0x6eb   :  { %10614 = vmatprep.mubr.msk.f32.mxu1 %vm11581_vm1, %v11580_v10  ;;  %10617 = vmatprep.subr.mxu1 %v11580_v10  ;;  %v8127_v46 = vand.u32 4294901760, %v8126_v43  ;;  %v11012_v0 = vpack.c.bf16 %v8126_v43, %v8119_v42 }
 0x6ed   :  { %10615 = vmatmul.mubr.f32.vlgmr.msra.gmra.mrb[14].mxu1 %v6720_v4  ;;  %v8128_v49 = vsub.f32 %v8126_v43, %v8127_v46 }
 0x6ee   :  { %10618 = vmatpush3.msra.mxu1 %v6731_v5  ;;  %10619 = vmatprep.mubr.msk.f32.mxu1 %vm11581_vm1, %v11580_v10 }
 0x6ef   :  { %10622 = vmatprep.subr.mxu1 %v11580_v10  ;;  %v8129_v52 = vand.u32 4294901760, %v8128_v49 }
 0x6f5   :  { %10620 = vmatmul.mubr.f32.vlgmr.msra.gmra.mrb[14].mxu1 %v6716_v54 }
 0x6f6   :  { %10623 = vmatpush3.msra.mxu1 %v12207_v57  ;;  %10624 = vmatprep.mubr.msk.f32.mxu1 %vm11581_vm1, %v11580_v10 }
 0x6f7   :  { %10627 = vmatprep.subr.mxu1 %v11580_v10 }
 0x6fd   :  { %10625 = vmatmul.mubr.f32.vlgmr.msra.gmra.mrb[14].mxu1 %v6717_v56  ;;  %v8135_v56 = vsub.f32 %v8133_v63, %v8134_v53 }
 0x6fe   :  { %10628 = vmatpush3.msra.mxu1 %v12204_v55  ;;  %10629 = vmatprep.mubr.msk.f32.mxu1 %vm11581_vm1, %v11580_v10 }
 0x6ff   :  { %10632 = vmatprep.subr.mxu1 %v11580_v10 }
 0x705   :  { %10630 = vmatmul.mubr.f32.vlgmr.msra.gmra.mrb[14].mxu1 %v6718_v58  ;;  %v8136_v58 = vand.u32 4294901760, %v8135_v56 }
 0x706   :  { %10633 = vmatpush3.msra.mxu1 %v12214_v60  ;;  %10634 = vmatprep.mubr.msk.f32.mxu1 %vm11581_vm1, %v11580_v10 }
 0x707   :  { %10637 = vmatprep.subr.mxu1 %v11580_v10 }
 0x70d   :  { %10635 = vmatmul.mubr.f32.vlgmr.msra.gmra.mrb[14].mxu1 %v6716_v54 }
 0x70e   :  { %10638 = vmatpush3.msra.mxu1 %v12204_v55  ;;  %10639 = vmatprep.mubr.msk.f32.mxu1 %vm11581_vm1, %v11580_v10 }
 0x70f   :  { %10672 = vmatprep.subr.mxu1 %v11580_v10 }
 0x715   :  { %v4337_v6 = vpop.f32.mrb[8].mxu1  ;;  %10640 = vmatmul.mubr.f32.vlgmr.msra.gmra.mrb[14].mxu1 %v6716_v54  ;;  %v8141_v54 = vand.u32 4294901760, %v8140_v50 }
 0x716   :  { %10673 = vmatpush3.msra.mxu1 %v12204_v55  ;;  %4342 = vrot.lane.b32.xlu1 %v4337_v6, %s11590_s30  ;;  %v10461_v7 = vpop.f32.mrb[9].mxu1 }
 0x717   :  { %10674 = vmatprep.mubr.msk.f32.mxu1 %vm11581_vm1, %v11580_v10  ;;  %10677 = vmatprep.subr.mxu1 %v11580_v10  ;;  %v11032_v3 = vpack.c.bf16 %v8141_v54, %v8134_v53 }
 0x741   :  { %v5259_v8 = vpop.f32.mrb[10].mxu1 }
 0x742   :  { %5263 = vst.msk [vmem:[#allocation2 + $0x8] sm:$0xff] %vm677_vm2, %v5259_v8  ;;  %v10521_v9 = vpop.f32.mrb[11].mxu1 }
 0x74a   :  { %v7559_v13 = vpop.xlane.xlu0 %7558 }
 0x74b   :  { %11444 = vrcp.f32 %v7559_v13 }
 0x755   :  { %v11445_v14 = vpop.eup %11444 }
 0x756   :  { %v7561_v15 = vmul.f32 %v11445_v14, %v12183_v45  ;;  %v8120_v45 = vand.u32 4294901760, %v8119_v42 }
 0x758   :  { %v7563_v59 = vsel %vm677_vm2, %v7561_v15, 0  ;;  %v8121_v48 = vsub.f32 %v8119_v42, %v8120_v45  ;;  %v11028_v2 = vpack.c.bf16 %v8127_v46, %v8120_v45  ;;  %v8731_v45 = vsub.f32 %v8605_v34, %v8629_v36 }
 0x759   :  { %v7631_v61 = vand.u32 4294901760, %v7563_v59 }
 0x75a   :  { %v8122_v51 = vand.u32 4294901760, %v8121_v48  ;;  %v8732_v49 = vand.u32 4294901760, %v8731_v45 }
 0x75b   :  { %v7632_v16 = vsub.f32 %v7563_v59, %v7631_v61  ;;  %v11454_v59 = vld [vmem:[#allocation3 + $0x8] sm:$0xff] }
 0x75c   :  { %v3427_v17 = vpop.permute.xlu1 %3426 }
 0x75d   :  { %3430 = vst.msk [vmem:[#allocation2] sm:$0xff] %vm3429_vm4, %v3427_v17  ;;  %v7633_v18 = vand.u32 4294901760, %v7632_v16  ;;  %v11455_v17 = vld [vmem:[#allocation3] sm:$0xff] }
 0x75f   :  { %v7634_v19 = vsub.f32 %v7632_v16, %v7633_v18 }
 0x761   :  { %v7635_v20 = vand.u32 4294901760, %v7634_v19 }
 0x763   :  { %10675 = vmatmul.mubr.f32.vlgmr.msra.gmra.mrb[16].mxu1 %v7635_v20 }
 0x764   :  { %10678 = vmatpush3.msra.mxu1 %v6731_v5  ;;  %10679 = vmatprep.mubr.msk.f32.mxu1 %vm11581_vm1, %v11580_v10 }
 0x765   :  { %10682 = vmatprep.subr.mxu1 %v11580_v10 }
 0x76b   :  { %10680 = vmatmul.mubr.f32.vlgmr.msra.gmra.mrb[16].mxu1 %v7631_v61 }
 0x76c   :  { %10683 = vmatpush3.msra.mxu1 %v12207_v57  ;;  %10684 = vmatprep.mubr.msk.f32.mxu1 %vm11581_vm1, %v11580_v10  ;;  %v8142_v57 = vsub.f32 %v8140_v50, %v8141_v54 }
 0x76d   :  { %10687 = vmatprep.subr.mxu1 %v11580_v10 }
 0x773   :  { %10685 = vmatmul.mubr.f32.vlgmr.msra.gmra.mrb[16].mxu1 %v7632_v16 }
 0x774   :  { %10688 = vmatpush3.msra.mxu1 %v12204_v55  ;;  %10689 = vmatprep.mubr.msk.f32.mxu1 %vm11581_vm1, %v11580_v10 }
 0x775   :  { %10692 = vmatprep.subr.mxu1 %v11580_v10 }
 0x77b   :  { %10690 = vmatmul.mubr.f32.vlgmr.msra.gmra.mrb[16].mxu1 %v7633_v18 }
 0x77c   :  { %10693 = vmatpush3.msra.mxu1 %v12214_v60  ;;  %10694 = vmatprep.mubr.msk.f32.mxu1 %vm11581_vm1, %v11580_v10  ;;  %v8143_v60 = vand.u32 4294901760, %v8142_v57 }
 0x77d   :  { %10697 = vmatprep.subr.mxu1 %v11580_v10 }
 0x77e   :  { %v11008_v62 = vpack.c.bf16 %v8143_v60, %v8136_v58 }
 0x783   :  { %10695 = vmatmul.mubr.f32.vlgmr.msra.gmra.mrb[16].mxu1 %v7631_v61 }
 0x784   :  { %10698 = vmatpush3.msra.mxu1 %v12204_v55  ;;  %10699 = vmatprep.mubr.msk.f32.mxu1 %vm11581_vm1, %v11580_v10  ;;  %v11004_v55 = vpack.c.bf16 %v8129_v52, %v8122_v51  ;;  %v8733_v51 = vsub.f32 %v8731_v45, %v8732_v49 }
 0x786   :  { %11005 = vmatprep.subr.bf16.mxu0 %v11004_v55  ;;  %v8734_v53 = vand.u32 4294901760, %v8733_v51 }
 0x788   :  { %v4343_v21 = vpop.permute.xlu1 %4342 }
 0x789   :  { %4346 = vst.msk [vmem:[#allocation2] sm:$0xff] %vm4345_vm5, %v4343_v21 }
 0x78b   :  { %10700 = vmatmul.mubr.f32.vlgmr.msra.gmra.mrb[16].mxu1 %v7631_v61 }
 0x790   :  { %v8016_v22 = vld [vmem:[#allocation2] sm:$0xff] }
 0x791   :  { %v8023_v23 = vsel %vm92_vm0, %v8016_v22, 0 }
 0x792   :  { %v12272_v24 = vand.u32 4294901760, %v8023_v23 }
 0x794   :  { %v12275_v25 = vsub.f32 %v8023_v23, %v12272_v24 }
 0x796   :  { %v8099_v26 = vand.u32 4294901760, %v12275_v25 }
 0x798   :  { %v8100_v27 = vsub.f32 %v12275_v25, %v8099_v26 }
 0x79a   :  { %v8101_v10 = vand.u32 4294901760, %v8100_v27 }
 0x79c   :  { %10710 = vmatprep.mubr.f32.mxu0 %v8101_v10 }
 0x7bc   :  { %v6170_v28 = vpop.f32.mrb[12].mxu1 }
 0x7bd   :  { %6175 = vrot.lane.b32.xlu1 %v6170_v28, %s11577_s18  ;;  %v10581_v11 = vpop.f32.mrb[13].mxu1 }
 0x7e8   :  { %v7092_v29 = vpop.f32.mrb[14].mxu1 }
 0x7e9   :  { %7097 = vrot.lane.b32.xlu0 %v7092_v29, %s11589_s29  ;;  %v10641_v30 = vpop.f32.mrb[15].mxu1  ;;  %v8602_v29 = vld [vmem:[%s12497_s7] sm:$0xff] }
 0x7ea   :  { %v8603_v30 = vld [vmem:[%s12497_s7 + $0x8] sm:$0xff]  ;;  %v8620_v32 = vand.u32 4294901760, %v8602_v29 }
 0x7eb   :  { %v8623_v33 = vand.u32 4294901760, %v8603_v30 }
 0x7ec   :  { %v8710_v12 = vsub.f32 %v8602_v29, %v8620_v32 }
 0x7ed   :  { %v12346_v37 = vpack.c.bf16 %v8623_v33, %v8620_v32  ;;  %v9167_v32 = vld [vmem:[%s12499_s9 + $0x10] sm:$0xff] }
 0x7ee   :  { %v9194_v34 = vand.u32 4294901760, %v9167_v32 }
 0x7ef   :  { %11045 = vmatprep.subr.bf16.mxu1 %v12346_v37 }
 0x7f0   :  { %11047 = vmatpush3.bf16.msra.mxu1 %v12346_v37 }
 0x82f   :  { %v6176_v31 = vpop.permute.xlu1 %6175 }
 0x830   :  { %6178 = vst.msk [vmem:[#allocation2 + $0x8] sm:$0xff] %vm2506_vm3, %v6176_v31  ;;  %v8604_v31 = vld [vmem:[%s12497_s7 + $0x10] sm:$0xff] }
 0x831   :  { %v8626_v35 = vand.u32 4294901760, %v8604_v31 }
 0x833   :  { %v12348_v38 = vpack.c.bf16 %v8629_v36, %v8626_v35 }
 0x835   :  { %11049 = vmatprep.subr.bf16.mxu1 %v12348_v38 }
 0x836   :  { %11051 = vmatpush3.bf16.msra.mxu1 %v12348_v38 }
 0x85b   :  { %v7098_v41 = vpop.permute.xlu0 %7097 }
 0x85c   :  { %7100 = vst.msk [vmem:[#allocation2 + $0x8] sm:$0xff] %vm3429_vm4, %v7098_v41 }
 0x85e   :  { %v8007_v44 = vpop.f32.mrb[16].mxu1 }
 0x85f   :  { %8012 = vrot.lane.b32.xlu1 %v8007_v44, %s11590_s30  ;;  %v10701_v47 = vpop.f32.mrb[17].mxu1  ;;  %v8724_v44 = vsub.f32 %v8604_v31, %v8626_v35 }
 0x861   :  { %v8725_v48 = vand.u32 4294901760, %v8724_v44  ;;  %v11064_v56 = vpack.c.bf16 %v8731_v45, %v8724_v44 }
 0x863   :  { %v8726_v50 = vsub.f32 %v8724_v44, %v8725_v48  ;;  %v11080_v58 = vpack.c.bf16 %v8732_v49, %v8725_v48 }
 0x865   :  { %v8727_v52 = vand.u32 4294901760, %v8726_v50 }
 0x867   :  { %v11056_v54 = vpack.c.bf16 %v8734_v53, %v8727_v52  ;;  %v9296_v52 = vsub.f32 %v9167_v32, %v9194_v34 }
 0x8d1   :  { %v8013_v4 = vpop.permute.xlu1 %8012 }
 0x8d2   :  { %8015 = vst.msk [vmem:[#allocation2 + $0x8] sm:$0xff] %vm4345_vm5, %v8013_v4 }
 0x8d9   :  { %v8017_v5 = vld [vmem:[#allocation2 + $0x8] sm:$0xff] }
 0x8da   :  { %v8026_v6 = vsel %vm92_vm0, %v8017_v5, 0  ;;  %v9792_v5 = vld [vmem:[#allocation6] ss:$0 sm:$0xff] }
 0x8db   :  { %v8107_v7 = vand.u32 4294901760, %v8026_v6 }
 0x8dd   :  { %v8108_v8 = vsub.f32 %v8026_v6, %v8107_v7 }
 0x8df   :  { %v8109_v9 = vand.u32 4294901760, %v8108_v8 }
 0x8e1   :  { %v8110_v13 = vsub.f32 %v8108_v8, %v8109_v9 }
 0x8e3   :  { %v8111_v14 = vand.u32 4294901760, %v8110_v13 }
 0x8e5   :  { %10711 = vmatmul.mubr.f32.vlgmr.msra.gmra.mrb[16].mxu0 %v8111_v14 }
 0x8e6   :  { %11007 = vmatpush3.bf16.msra.mxu0 %v11004_v55  ;;  %10721 = vmatprep.mubr.f32.mxu0 %v12272_v24 }
 0x8e7   :  { %11009 = vmatprep.subr.bf16.mxu0 %v11008_v62 }
 0x8ea   :  { %11011 = vmatpush3.bf16.msra.mxu0 %v11008_v62 }
 0x8eb   :  { %11013 = vmatprep.subr.bf16.mxu0 %v11012_v0 }
 0x8ed   :  { %10722 = vmatmul.mubr.f32.vlgmr.msra.gmra.mrb[16].mxu0 %v8107_v7 }
 0x8ee   :  { %11015 = vmatpush3.bf16.msra.mxu0 %v11012_v0  ;;  %10732 = vmatprep.mubr.f32.mxu0 %v12275_v25 }
 0x8ef   :  { %11017 = vmatprep.subr.bf16.mxu0 %v11016_v1 }
 0x8f2   :  { %11019 = vmatpush3.bf16.msra.mxu0 %v11016_v1 }
 0x8f3   :  { %11021 = vmatprep.subr.bf16.mxu0 %v12296_v39 }
 0x8f5   :  { %10733 = vmatmul.mubr.f32.vlgmr.msra.gmra.mrb[16].mxu0 %v8108_v8 }
 0x8f6   :  { %11023 = vmatpush3.bf16.msra.mxu0 %v12296_v39  ;;  %10743 = vmatprep.mubr.f32.mxu0 %v8099_v26 }
 0x8f7   :  { %11025 = vmatprep.subr.bf16.mxu0 %v12298_v40 }
 0x8fa   :  { %11027 = vmatpush3.bf16.msra.mxu0 %v12298_v40 }
 0x8fb   :  { %11029 = vmatprep.subr.bf16.mxu0 %v11028_v2 }
 0x8fd   :  { %10744 = vmatmul.mubr.f32.vlgmr.msra.gmra.mrb[16].mxu0 %v8109_v9 }
 0x8fe   :  { %11031 = vmatpush3.bf16.msra.mxu0 %v11028_v2  ;;  %10754 = vmatprep.mubr.f32.mxu0 %v12272_v24 }
 0x8ff   :  { %11033 = vmatprep.subr.bf16.mxu0 %v11032_v3 }
 0x902   :  { %11035 = vmatpush3.bf16.msra.mxu0 %v11032_v3 }
 0x903   :  { %11037 = vmatprep.subr.bf16.mxu0 %v12296_v39 }
 0x905   :  { %10755 = vmatmul.mubr.f32.vlgmr.msra.gmra.mrb[16].mxu0 %v8107_v7 }
 0x906   :  { %11039 = vmatpush3.bf16.msra.mxu0 %v12296_v39  ;;  %10765 = vmatprep.mubr.f32.mxu0 %v12272_v24  ;;  %v8717_v39 = vsub.f32 %v8603_v30, %v8623_v33  ;;  %v9168_v33 = vld [vmem:[%s12499_s9 + $0x18] sm:$0xff] }
 0x907   :  { %11041 = vmatprep.subr.bf16.mxu0 %v12298_v40  ;;  %v9197_v35 = vand.u32 4294901760, %v9168_v33 }
 0x908   :  { %v8718_v41 = vand.u32 4294901760, %v8717_v39  ;;  %v11060_v55 = vpack.c.bf16 %v8717_v39, %v8710_v12 }
 0x909   :  { %v12382_v36 = vpack.c.bf16 %v9197_v35, %v9194_v34  ;;  %v9303_v53 = vsub.f32 %v9168_v33, %v9197_v35 }
 0x90a   :  { %11043 = vmatpush3.bf16.msra.mxu0 %v12298_v40  ;;  %v8711_v40 = vand.u32 4294901760, %v8710_v12  ;;  %v8719_v43 = vsub.f32 %v8717_v39, %v8718_v41 }
 0x90c   :  { %v8712_v42 = vsub.f32 %v8710_v12, %v8711_v40  ;;  %v8720_v47 = vand.u32 4294901760, %v8719_v43  ;;  %v11076_v57 = vpack.c.bf16 %v8718_v41, %v8711_v40  ;;  %v9171_v41 = vld [vmem:[%s12499_s9 + $0x30] sm:$0xff] }
 0x90d   :  { %10766 = vmatmul.mubr.f32.vlgmr.msra.gmra.mrb[16].mxu0 %v8107_v7  ;;  %v9793_v7 = vld [vmem:[#allocation8] ss:$0 sm:$0xff]  ;;  %v9206_v43 = vand.u32 4294901760, %v9171_v41 }
 0x90e   :  { %v8713_v46 = vand.u32 4294901760, %v8712_v42  ;;  %v9172_v42 = vld [vmem:[%s12499_s9 + $0x38] sm:$0xff] }
 0x90f   :  { %v9209_v44 = vand.u32 4294901760, %v9172_v42 }
 0x910   :  { %v11052_v63 = vpack.c.bf16 %v8720_v47, %v8713_v46 }
 0x911   :  { %v12406_v45 = vpack.c.bf16 %v9209_v44, %v9206_v43 }
 0x912   :  { %11053 = vmatprep.subr.bf16.mxu1 %v11052_v63 }
 0x9e0   :  { %v10767_v15 = vpop.f32.mrb[16].mxu0 }
 0x9e1   :  { %v12322_v61 = vadd.f32 %v11454_v59, %v10767_v15  ;;  %v8546_v16 = vpop.f32.mrb[17].mxu0 }
 0x9e2   :  { %v12324_v18 = vadd.f32 %v11455_v17, %v8546_v16 }
 0x9e3   :  { %v8563_v19 = vsel %vm92_vm0, %v12322_v61, 0.0 }
 0x9e4   :  { %8564 = vadd.xlane.f32.xlu0 %v8563_v19  ;;  %v8560_v20 = vsel %vm92_vm0, %v12324_v18, 0.0 }
 0x9e5   :  { %8561 = vadd.xlane.f32.xlu1 %v8560_v20 }
 0xa71   :  { %v8565_v21 = vpop.xlane.xlu0 %8564 }
 0xa72   :  { %v8567_v22 = vmul.f32 0.03125, %v8565_v21  ;;  %v8562_v23 = vpop.xlane.xlu1 %8561 }
 0xa73   :  { %v8566_v24 = vmul.f32 0.03125, %v8562_v23 }
 0xa74   :  { %v8569_v25 = vsub.f32 %v12322_v61, %v8567_v22 }
 0xa75   :  { %v8568_v26 = vsub.f32 %v12324_v18, %v8566_v24 }
 0xa76   :  { %v8571_v28 = vmul.f32 %v8569_v25, %v8569_v25 }
 0xa77   :  { %v8570_v27 = vmul.f32 %v8568_v26, %v8568_v26 }
 0xa78   :  { %v8575_v11 = vsel %vm92_vm0, %v8571_v28, 0.0 }
 0xa79   :  { %v8572_v10 = vsel %vm92_vm0, %v8570_v27, 0.0 }
 0xa7a   :  { %8573 = vadd.xlane.f32.xlu1 %v8572_v10 }
 0xa7e   :  { %8576 = vadd.xlane.f32.xlu1 %v8575_v11  ;;  %v9166_v11 = vld [vmem:[%s12499_s9 + $0x8] sm:$0xff] }
 0xa7f   :  { %v9191_v30 = vand.u32 4294901760, %v9166_v11 }
 0xa81   :  { %v9289_v47 = vsub.f32 %v9166_v11, %v9191_v30 }
 0xa83   :  { %v9290_v49 = vand.u32 4294901760, %v9289_v47 }
 0xa85   :  { %v9291_v51 = vsub.f32 %v9289_v47, %v9290_v49 }
 0xb07   :  { %v8574_v60 = vpop.xlane.xlu1 %8573 }
 0xb08   :  { %v8578_v62 = vmul.f32 0.03125, %v8574_v60 }
 0xb0a   :  { %v8580_v0 = vadd.f32 1e-05, %v8578_v62 }
 0xb0b   :  { %v8577_v1 = vpop.xlane.xlu1 %8576 }
 0xb0c   :  { %11446 = vrsqrt.f32 %v8580_v0  ;;  %v8579_v2 = vmul.f32 0.03125, %v8577_v1 }
 0xb0e   :  { %v8581_v3 = vadd.f32 1e-05, %v8579_v2 }
 0xb10   :  { %11448 = vrsqrt.f32 %v8581_v3 }
 0xb16   :  { %v11447_v4 = vpop.eup %11446 }
 0xb17   :  { %v8584_v6 = vmul.f32 %v11447_v4, %v8568_v26 }
 0xb19   :  { %v8592_v8 = vmul.f32 %v9792_v5, %v8584_v6 }
 0xb1a   :  { %v11449_v9 = vpop.eup %11448 }
 0xb1b   :  { %v8585_v13 = vmul.f32 %v11449_v9, %v8569_v25  ;;  %v8600_v14 = vadd.f32 %v9793_v7, %v8592_v8  ;;  %v9165_v25 = vld [vmem:[%s12499_s9] sm:$0xff] }
 0xb1c   :  { %v9188_v29 = vand.u32 4294901760, %v9165_v25 }
 0xb1d   :  { %v8593_v15 = vmul.f32 %v9792_v5, %v8585_v13  ;;  %v8614_v59 = vsel %vm92_vm0, %v8600_v14, 0  ;;  %v9324_v13 = vsub.f32 %v9171_v41, %v9206_v43 }
 0xb1e   :  { %v8688_v16 = vand.u32 4294901760, %v8614_v59  ;;  %v12370_v31 = vpack.c.bf16 %v9191_v30, %v9188_v29  ;;  %v9282_v46 = vsub.f32 %v9165_v25, %v9188_v29  ;;  %v9794_v29 = vld [vmem:[#allocation9] ss:$0 sm:$0xff] }
 0xb1f   :  { %v8601_v17 = vadd.f32 %v9793_v7, %v8593_v15  ;;  %v9331_v15 = vsub.f32 %v9172_v42, %v9209_v44 }
 0xb20   :  { %v8689_v19 = vsub.f32 %v8614_v59, %v8688_v16  ;;  %11141 = vmatprep.subr.bf16.mxu0 %v12370_v31  ;;  %v9283_v48 = vand.u32 4294901760, %v9282_v46 }
 0xb21   :  { %v8617_v20 = vsel %vm92_vm0, %v8601_v17, 0  ;;  %11143 = vmatpush3.bf16.msra.mxu0 %v12370_v31  ;;  %v9325_v17 = vand.u32 4294901760, %v9324_v13  ;;  %v12436_v11 = vpack.c.bf16 %v9331_v15, %v9324_v13 }
 0xb22   :  { %v8690_v21 = vand.u32 4294901760, %v8689_v19  ;;  %v8698_v22 = vand.u32 4294901760, %v8617_v20  ;;  %11145 = vmatprep.subr.bf16.mxu0 %v12382_v36  ;;  %v9284_v50 = vsub.f32 %v9282_v46, %v9283_v48 }
 0xb24   :  { %v8691_v23 = vsub.f32 %v8689_v19, %v8690_v21  ;;  %v8699_v24 = vsub.f32 %v8617_v20, %v8698_v22 }
 0xb25   :  { %11147 = vmatpush3.bf16.msra.mxu0 %v12382_v36 }
 0xb26   :  { %v8692_v27 = vand.u32 4294901760, %v8691_v23  ;;  %v8700_v10 = vand.u32 4294901760, %v8699_v24 }
 0xb28   :  { %10776 = vmatprep.mubr.f32.mxu1 %v8692_v27  ;;  %v8701_v26 = vsub.f32 %v8699_v24, %v8700_v10 }
 0xb2a   :  { %v8702_v28 = vand.u32 4294901760, %v8701_v26  ;;  %v12430_v26 = vpack.c.bf16 %v9289_v47, %v9282_v46 }
 0xb2c   :  { %10777 = vmatmul.mubr.f32.vlgmr.msra.gmra.mrb[18].mxu1 %v8702_v28  ;;  %v12432_v28 = vpack.c.bf16 %v9303_v53, %v9296_v52 }
 0xb2d   :  { %11055 = vmatpush3.bf16.msra.mxu1 %v11052_v63  ;;  %10787 = vmatprep.mubr.f32.mxu1 %v8688_v16  ;;  %v12412_v63 = vpack.c.bf16 %v9290_v49, %v9283_v48 }
 0xb2e   :  { %11057 = vmatprep.subr.bf16.mxu1 %v11056_v54 }
 0xb31   :  { %11059 = vmatpush3.bf16.msra.mxu1 %v11056_v54  ;;  %v9285_v54 = vand.u32 4294901760, %v9284_v50 }
 0xb32   :  { %11061 = vmatprep.subr.bf16.mxu1 %v11060_v55 }
 0xb34   :  { %10788 = vmatmul.mubr.f32.vlgmr.msra.gmra.mrb[18].mxu1 %v8698_v22 }
 0xb35   :  { %11063 = vmatpush3.bf16.msra.mxu1 %v11060_v55  ;;  %10798 = vmatprep.mubr.f32.mxu1 %v8689_v19  ;;  %v9292_v55 = vand.u32 4294901760, %v9291_v51  ;;  %v9332_v19 = vand.u32 4294901760, %v9331_v15 }
 0xb36   :  { %11065 = vmatprep.subr.bf16.mxu1 %v11064_v56 }
 0xb37   :  { %v9333_v23 = vsub.f32 %v9331_v15, %v9332_v19 }
 0xb39   :  { %11067 = vmatpush3.bf16.msra.mxu1 %v11064_v56  ;;  %v9297_v56 = vand.u32 4294901760, %v9296_v52  ;;  %v9334_v27 = vand.u32 4294901760, %v9333_v23 }
 0xb3a   :  { %11069 = vmatprep.subr.bf16.mxu1 %v12346_v37 }
 0xb3b   :  { %v9298_v60 = vsub.f32 %v9296_v52, %v9297_v56 }
 0xb3c   :  { %10799 = vmatmul.mubr.f32.vlgmr.msra.gmra.mrb[18].mxu1 %v8699_v24 }
 0xb3d   :  { %11071 = vmatpush3.bf16.msra.mxu1 %v12346_v37  ;;  %10809 = vmatprep.mubr.f32.mxu1 %v8690_v21  ;;  %v9299_v3 = vand.u32 4294901760, %v9298_v60  ;;  %v9326_v21 = vsub.f32 %v9324_v13, %v9325_v17 }
 0xb3e   :  { %11073 = vmatprep.subr.bf16.mxu1 %v12348_v38 }
 0xb3f   :  { %v9327_v24 = vand.u32 4294901760, %v9326_v21 }
 0xb41   :  { %11075 = vmatpush3.bf16.msra.mxu1 %v12348_v38 }
 0xb42   :  { %11077 = vmatprep.subr.bf16.mxu1 %v11076_v57 }
 0xb44   :  { %10810 = vmatmul.mubr.f32.vlgmr.msra.gmra.mrb[18].mxu1 %v8700_v10  ;;  %v12428_v10 = vpack.c.bf16 %v9334_v27, %v9327_v24 }
 0xb45   :  { %11079 = vmatpush3.bf16.msra.mxu1 %v11076_v57  ;;  %10820 = vmatprep.mubr.f32.mxu1 %v8688_v16  ;;  %v9304_v57 = vand.u32 4294901760, %v9303_v53 }
 0xb46   :  { %11081 = vmatprep.subr.bf16.mxu1 %v11080_v58 }
 0xb47   :  { %v12417_v1 = vpack.c.bf16 %v9304_v57, %v9297_v56  ;;  %v9305_v2 = vsub.f32 %v9303_v53, %v9304_v57 }
 0xb49   :  { %11083 = vmatpush3.bf16.msra.mxu1 %v11080_v58  ;;  %v12415_v58 = vpack.c.bf16 %v9292_v55, %v9285_v54  ;;  %v9306_v6 = vand.u32 4294901760, %v9305_v2 }
 0xb4a   :  { %11085 = vmatprep.subr.bf16.mxu1 %v12346_v37 }
 0xb4b   :  { %v12422_v14 = vpack.c.bf16 %v9306_v6, %v9299_v3 }
 0xb4c   :  { %10821 = vmatmul.mubr.f32.vlgmr.msra.gmra.mrb[18].mxu1 %v8698_v22 }
 0xb4d   :  { %11087 = vmatpush3.bf16.msra.mxu1 %v12346_v37  ;;  %10831 = vmatprep.mubr.f32.mxu1 %v8688_v16  ;;  %v9169_v37 = vld [vmem:[%s12499_s9 + $0x20] sm:$0xff] }
 0xb4e   :  { %11089 = vmatprep.subr.bf16.mxu1 %v12348_v38  ;;  %v9200_v12 = vand.u32 4294901760, %v9169_v37 }
 0xb50   :  { %v9310_v62 = vsub.f32 %v9169_v37, %v9200_v12 }
 0xb51   :  { %11091 = vmatpush3.bf16.msra.mxu1 %v12348_v38  ;;  %v9170_v38 = vld [vmem:[%s12499_s9 + $0x28] sm:$0xff] }
 0xb52   :  { %11093 = vmatprep.subr.bf16.mxu1 %v12370_v31  ;;  %v9203_v39 = vand.u32 4294901760, %v9170_v38  ;;  %v9311_v4 = vand.u32 4294901760, %v9310_v62 }
 0xb54   :  { %10832 = vmatmul.mubr.f32.vlgmr.msra.gmra.mrb[18].mxu1 %v8698_v22  ;;  %v12394_v40 = vpack.c.bf16 %v9203_v39, %v9200_v12  ;;  %v9317_v0 = vsub.f32 %v9170_v38, %v9203_v39  ;;  %v9312_v8 = vsub.f32 %v9310_v62, %v9311_v4  ;;  %v12426_v22 = vpack.c.bf16 %v9332_v19, %v9325_v17 }
 0xb55   :  { %11095 = vmatpush3.bf16.msra.mxu1 %v12370_v31 }
 0xb56   :  { %11097 = vmatprep.subr.bf16.mxu1 %v12382_v36  ;;  %11149 = vmatprep.subr.bf16.mxu0 %v12394_v40  ;;  %v9318_v5 = vand.u32 4294901760, %v9317_v0  ;;  %v9313_v59 = vand.u32 4294901760, %v9312_v8  ;;  %v12434_v25 = vpack.c.bf16 %v9317_v0, %v9310_v62 }
 0xb57   :  { %11151 = vmatpush3.bf16.msra.mxu0 %v12394_v40 }
 0xb58   :  { %11153 = vmatprep.subr.bf16.mxu0 %v12406_v45  ;;  %v12420_v7 = vpack.c.bf16 %v9318_v5, %v9311_v4  ;;  %v9319_v9 = vsub.f32 %v9317_v0, %v9318_v5 }
 0xb59   :  { %11099 = vmatpush3.bf16.msra.mxu1 %v12382_v36 }
 0xb5a   :  { %11101 = vmatprep.subr.bf16.mxu1 %v12394_v40  ;;  %v9320_v16 = vand.u32 4294901760, %v9319_v9 }
 0xb5b   :  { %11155 = vmatpush3.bf16.msra.mxu0 %v12406_v45 }
 0xb5c   :  { %11157 = vmatprep.subr.bf16.mxu0 %v12412_v63  ;;  %v12424_v20 = vpack.c.bf16 %v9320_v16, %v9313_v59 }
 0xb5d   :  { %11103 = vmatpush3.bf16.msra.mxu1 %v12394_v40 }
 0xb5e   :  { %11105 = vmatprep.subr.bf16.mxu1 %v12406_v45 }
 0xb61   :  { %11107 = vmatpush3.bf16.msra.mxu1 %v12406_v45 }
 0xb62   :  { %11109 = vmatprep.subr.bf16.mxu1 %v12415_v58 }
 0xc27   :  { %v10833_v30 = vpop.f32.mrb[18].mxu1 }
 0xc28   :  { %v11188_v32 = vadd.f32 %v10833_v30, %v9794_v29  ;;  %v9137_v33 = vpop.f32.mrb[19].mxu1 }
 0xc29   :  { %v11189_v34 = vadd.f32 %v9794_v29, %v9137_v33 }
 0xc2a   :  { %v9148_v35 = vmul.f32 %v11188_v32, %v11188_v32 }
 0xc2b   :  { %v9147_v37 = vmul.f32 %v11189_v34, %v11189_v34 }
 0xc2c   :  { %v9150_v38 = vmul.f32 %v11188_v32, %v9148_v35 }
 0xc2d   :  { %v9149_v12 = vmul.f32 %v11189_v34, %v9147_v37 }
 0xc2e   :  { %v9152_v39 = vmul.f32 0.044715, %v9150_v38 }
 0xc2f   :  { %v9151_v41 = vmul.f32 0.044715, %v9149_v12 }
 0xc30   :  { %v9154_v42 = vadd.f32 %v11188_v32, %v9152_v39 }
 0xc31   :  { %v9153_v43 = vadd.f32 %v11189_v34, %v9151_v41 }
 0xc32   :  { %v9156_v44 = vmul.f32 0.7978846, %v9154_v42 }
 0xc33   :  { %v9155_v46 = vmul.f32 0.7978846, %v9153_v43 }
 0xc34   :  { %11450 = vtanh.f32 %v9156_v44 }
 0xc35   :  { %11452 = vtanh.f32 %v9155_v46 }
 0xc3e   :  { %v11451_v47 = vpop.eup %11450 }
 0xc3f   :  { %v11453_v48 = vpop.eup %11452  ;;  %v9160_v49 = vadd.f32 1.0, %v11451_v47 }
 0xc40   :  { %v9159_v50 = vadd.f32 1.0, %v11453_v48 }
 0xc41   :  { %v9162_v51 = vmul.f32 0.5, %v9160_v49 }
 0xc42   :  { %v9161_v52 = vmul.f32 0.5, %v9159_v50 }
 0xc43   :  { %v9164_v53 = vmul.f32 %v11188_v32, %v9162_v51 }
 0xc44   :  { %v9163_v54 = vmul.f32 %v11189_v34, %v9161_v52 }
 0xc45   :  { %v9185_v55 = vsel %vm9180_vm6, %v9164_v53, 0 }
 0xc46   :  { %v9270_v56 = vand.u32 4294901760, %v9185_v55  ;;  %v9182_v57 = vsel %vm9180_vm6, %v9163_v54, 0 }
 0xc47   :  { %v9260_v60 = vand.u32 4294901760, %v9182_v57 }
 0xc48   :  { %v9271_v62 = vsub.f32 %v9185_v55, %v9270_v56 }
 0xc49   :  { %v9261_v0 = vsub.f32 %v9182_v57, %v9260_v60 }
 0xc4a   :  { %v9272_v2 = vand.u32 4294901760, %v9271_v62 }
 0xc4b   :  { %v9262_v3 = vand.u32 4294901760, %v9261_v0 }
 0xc4c   :  { %v9273_v4 = vsub.f32 %v9271_v62, %v9272_v2 }
 0xc4d   :  { %10907 = vmatprep.mubr.f32.mxu0 %v9262_v3  ;;  %v9263_v5 = vsub.f32 %v9261_v0, %v9262_v3 }
 0xc4e   :  { %10908 = vmatmul.mubr.f32.vlgmr.msra.gmra.mrb[18].mxu0 %v9272_v2  ;;  %v9274_v8 = vand.u32 4294901760, %v9273_v4 }
 0xc4f   :  { %11159 = vmatpush3.bf16.msra.mxu0 %v12412_v63  ;;  %10926 = vmatprep.mubr.f32.mxu0 %v9260_v60  ;;  %v9264_v6 = vand.u32 4294901760, %v9263_v5 }
 0xc50   :  { %11161 = vmatprep.subr.bf16.mxu0 %v12417_v1 }
 0xc51   :  { %10850 = vmatprep.mubr.f32.mxu1 %v9264_v6 }
 0xc52   :  { %10851 = vmatmul.mubr.f32.vlgmr.msra.gmra.mrb[20].mxu1 %v9274_v8 }
 0xc53   :  { %11111 = vmatpush3.bf16.msra.mxu1 %v12415_v58  ;;  %11163 = vmatpush3.bf16.msra.mxu0 %v12417_v1 }
 0xc54   :  { %10869 = vmatprep.mubr.f32.mxu1 %v9260_v60  ;;  %11113 = vmatprep.subr.bf16.mxu1 %v12422_v14 }
 0xc55   :  { %11165 = vmatprep.subr.bf16.mxu0 %v12420_v7 }
 0xc57   :  { %11115 = vmatpush3.bf16.msra.mxu1 %v12422_v14  ;;  %11167 = vmatpush3.bf16.msra.mxu0 %v12420_v7 }
 0xc58   :  { %11117 = vmatprep.subr.bf16.mxu1 %v12424_v20  ;;  %11169 = vmatprep.subr.bf16.mxu0 %v12426_v22 }
 0xc5b   :  { %11119 = vmatpush3.bf16.msra.mxu1 %v12424_v20  ;;  %11171 = vmatpush3.bf16.msra.mxu0 %v12426_v22 }
 0xc5c   :  { %11121 = vmatprep.subr.bf16.mxu1 %v12428_v10  ;;  %11173 = vmatprep.subr.bf16.mxu0 %v12370_v31 }
 0xc5e   :  { %10927 = vmatmul.mubr.f32.vlgmr.msra.gmra.mrb[18].mxu0 %v9270_v56 }
 0xc5f   :  { %11123 = vmatpush3.bf16.msra.mxu1 %v12428_v10  ;;  %11175 = vmatpush3.bf16.msra.mxu0 %v12370_v31 }
 0xc60   :  { %10945 = vmatprep.mubr.f32.mxu0 %v9260_v60  ;;  %11125 = vmatprep.subr.bf16.mxu1 %v12430_v26 }
 0xc61   :  { %11177 = vmatprep.subr.bf16.mxu0 %v12382_v36 }
 0xc62   :  { %10870 = vmatmul.mubr.f32.vlgmr.msra.gmra.mrb[20].mxu1 %v9270_v56 }
 0xc63   :  { %11127 = vmatpush3.bf16.msra.mxu1 %v12430_v26  ;;  %10888 = vmatprep.mubr.f32.mxu1 %v9261_v0 }
 0xc64   :  { %11179 = vmatpush3.bf16.msra.mxu0 %v12382_v36  ;;  %11129 = vmatprep.subr.bf16.mxu1 %v12432_v28 }
 0xc65   :  { %11181 = vmatprep.subr.bf16.mxu0 %v12394_v40 }
 0xc67   :  { %11131 = vmatpush3.bf16.msra.mxu1 %v12432_v28 }
 0xc68   :  { %11183 = vmatpush3.bf16.msra.mxu0 %v12394_v40  ;;  %11133 = vmatprep.subr.bf16.mxu1 %v12434_v25  ;;  %v9795_v40 = vld [vmem:[%s12500_s10] ss:$0 sm:$0xff] }
 0xc69   :  { %11185 = vmatprep.subr.bf16.mxu0 %v12406_v45 }
 0xc6b   :  { %11135 = vmatpush3.bf16.msra.mxu1 %v12434_v25 }
 0xc6c   :  { %11187 = vmatpush3.bf16.msra.mxu0 %v12406_v45  ;;  %11137 = vmatprep.subr.bf16.mxu1 %v12436_v11 }
 0xc6f   :  { %10946 = vmatmul.mubr.f32.vlgmr.msra.gmra.mrb[18].mxu0 %v9270_v56  ;;  %11139 = vmatpush3.bf16.msra.mxu1 %v12436_v11 }
 0xc72   :  { %10889 = vmatmul.mubr.f32.vlgmr.msra.gmra.mrb[20].mxu1 %v9271_v62 }
 0xd42   :  { %v10947_v31 = vpop.f32.mrb[18].mxu0 }
 0xd43   :  { %v9757_v36 = vpop.f32.mrb[19].mxu0 }
 0xd45   :  { %v10890_v63 = vpop.f32.mrb[20].mxu1 }
 0xd46   :  { %v11190_v58 = vadd.f32 %v10890_v63, %v9795_v40  ;;  %v9481_v1 = vpop.f32.mrb[21].mxu1 }
 0xd47   :  { %v11192_v7 = vadd.f32 %v9795_v40, %v9481_v1 }
 0xd48   :  { %v11191_v9 = vadd.f32 %v11190_v58, %v10947_v31 }
 0xd49   :  { %v11193_v45 = vadd.f32 %v11192_v7, %v9757_v36 }
 0xd4a   :  { %v9768_v13 = vadd.f32 %v11191_v9, %v12322_v61 }
 0xd4b   :  { %v9767_v14 = vadd.f32 %v11193_v45, %v12324_v18 }
 0xd4c   :  { %9770 = vst.msk [vmem:[#allocation11 + $0x8] sm:$0xff] %vm92_vm0, %v9768_v13 }
 0xd4d   :  { %9769 = vst.msk [vmem:[#allocation11] sm:$0xff] %vm92_vm0, %v9767_v14 }
 0xd4e   :  { %11555 = shalt.err (!%p11552_p8)
}
 0xd4f   :  { %s11556_s20 = scalar_lea.hbm %s12501_s11, 256 }
 0xd50   :  { %p11557_p9 = scmp.ne.s32.totalorder %s12501_s11, %s11556_s20  ;;  %p11560_p10 = scmp.lt.u32.totalorder %s11556_s20, %s12501_s11 }
 0xd52   :  { %p11562_p11 = pnand %p11560_p10, %p11557_p9 }
 0xd54   :  { %11565 = shalt.err (!%p11562_p11)
}
 0xd55   :  { %9782 = dma.vmem_to_hbm [thread:$0]  %s9777_s4, 256, %s12501_s11, [#allocation5], %s11576_s5, %s11576_s5, %s11577_s18  }
 0xd56   :  { %11572 = dma.done.wait [#allocation5], 256  }
 0xd57   :  { %11573 = vsyncadd [#allocation5], 4294967040 }
 0xd58   :  { %9786 = vsyncpa [#allocation4], 1 }
 0xd59   :  { %9787 = vsyncpa [#allocation7], 1 }
 0xd5a   :  { %9788 = vsyncpa [#allocation10], 1 }
 0xd5b   :  { %9789 = vsyncpa [#allocation5], 1 }

</bundles_post_ra>
